<compile_context>
chip_gen: v5e
topology: v5e:2x2
jax: 0.10.0
libtpu: 0.0.40
codegen_flags: <defaults>
</compile_context>

<pallas_src>
import functools

import jax
import jax.numpy as jnp
from jax.experimental import pallas as pl
from jax.experimental.pallas import tpu as pltpu

# HH constants (match the PyTorch module)
V_NA, V_K, V_L, V_CA = 115.0, -12.0, 10.6, 120.0
GBAR_NA, GBAR_K, GBAR_L, GBAR_CA = 120.0, 36.0, 0.3, 0.1
ALPHA_CA, BETA_CA = 0.055, 0.94
ALPHA_HCA, BETA_HCA = 0.000457, 0.0065
THRESH = 2.0

LANE = 128      # lane width
SUBLANE = 8     # sublanes per vreg


def _round_up(x, m):
    return (x + m - 1) // m * m


def hh_kernel(x_ref, w_ref, p_ref, out_ref, state_ref):
    """One (batch-tile, time-chunk) grid step.

    x_ref    : (TC, TB, In_pad)  time-major input chunk (ones column appended)
    w_ref    : (In_pad, O_pad)   weight with bias folded in as row `In`
    p_ref    : (11, TB, O_pad)   per-channel params, pre-broadcast over batch
    out_ref  : (TC, TB, O_pad)   spikes for this chunk
    state_ref: (6, TB, O_pad)    HH state carried across time chunks (scratch)
    """
    t_chunk = pl.program_id(1)

    @pl.when(t_chunk == 0)
    def _init():
        state_ref[...] = jnp.zeros_like(state_ref)

    tc, tb, in_pad = x_ref.shape

    # ---- hoisted drive matmul: all TC timesteps in one MXU pass -------------
    x2 = x_ref[...].reshape(tc * tb, in_pad)                  # merge lead dims
    drive = jnp.dot(x2, w_ref[...],
                    preferred_element_type=jnp.float32)       # (TC*TB, O_pad)

    # Per-channel parameters (already broadcast to (TB, O_pad)).
    dt = p_ref[0]
    c1_n, c0_n = p_ref[1], p_ref[2]
    c1_m, c0_m = p_ref[3], p_ref[4]
    c1_h, c0_h = p_ref[5], p_ref[6]
    c1_ca, c0_ca = p_ref[7], p_ref[8]
    c1_hca, c0_hca = p_ref[9], p_ref[10]

    v = state_ref[0]
    y = state_ref[1]
    m = state_ref[2]
    h = state_ref[3]
    mCaL = state_ref[4]
    hCa = state_ref[5]

    # ---- recurrence: statically unrolled, pure VPU work ----------------------
    for t in range(tc):
        d = drive[t * tb:(t + 1) * tb, :]       # (TB, O_pad) sublane-aligned
        g_Na = (GBAR_NA * h) * (m * m * m)
        y2 = y * y
        g_K = GBAR_K * (y2 * y2)
        g_Ca = (GBAR_CA * hCa) * (mCaL * mCaL)
        I_Na = g_Na * (v - V_NA)
        I_K = g_K * (v - V_K)
        I_L = GBAR_L * (v - V_L)
        I_Ca = g_Ca * (v - V_CA)
        v = v + (d - I_Na - I_K - I_L - I_Ca) * dt
        # folded gate updates: g <- g*c1 + c0   (c1 = 1-(a+b)*dt, c0 = a*dt)
        y = y * c1_n + c0_n
        m = m * c1_m + c0_m
        h = h * c1_h + c0_h
        mCaL = mCaL * c1_ca + c0_ca
        hCa = hCa * c1_hca + c0_hca
        out_ref[t] = (v - THRESH > 0.0).astype(jnp.float32)   # full (8,128) vst

    # carry state to the next time chunk
    state_ref[0] = v
    state_ref[1] = y
    state_ref[2] = m
    state_ref[3] = h
    state_ref[4] = mCaL
    state_ref[5] = hCa


@functools.partial(jax.jit, static_argnames=("time_chunk", "batch_tile"))
def hh_neuron_forward(x_bti, w_oi, bias_o, dt_o, an, bn, am, bm, ah, bh,
                      *, time_chunk=16, batch_tile=8):
    """x_bti: [B, T, In] float32 -> spikes [B, T, Out] float32 (PyTorch layout)."""
    f32 = jnp.float32
    B, T, In = x_bti.shape
    O = w_oi.shape[0]

    B_pad = _round_up(B, batch_tile)
    T_pad = _round_up(T, time_chunk)
    In_aug = In + 1                       # +1 ones column carries the bias
    In_pad = _round_up(In_aug, LANE)
    O_pad = _round_up(O, LANE)

    # Input: append ones column, go time-major, zero-pad to tile sizes.
    x = jnp.concatenate([x_bti.astype(f32), jnp.ones((B, T, 1), f32)], axis=-1)
    x = jnp.transpose(x, (1, 0, 2))                              # [T, B, In+1]
    x = jnp.pad(x, ((0, T_pad - T), (0, B_pad - B), (0, In_pad - In_aug)))

    # Weight [In_pad, O_pad]; bias lives in row `In`, padding rows/cols are 0.
    w = jnp.concatenate([jnp.transpose(w_oi.astype(f32), (1, 0)),
                         bias_o.astype(f32).reshape(1, O)], axis=0)
    w = jnp.pad(w, ((0, In_pad - In_aug), (0, O_pad - O)))

    # Per-channel params, folded into (c1, c0) pairs and zero/one-padded so
    # padded output channels stay frozen at exactly 0 (dt=0 -> c1=1, c0=0).
    pad = lambda v: jnp.pad(v.astype(f32), (0, O_pad - O))
    dt = pad(dt_o)

    def fold(a_coe, b_coe):
        a, b = pad(a_coe), pad(b_coe)
        return 1.0 - (a + b) * dt, a * dt

    c1_n, c0_n = fold(an, bn)
    c1_m, c0_m = fold(am, bm)
    c1_h, c0_h = fold(ah, bh)
    c1_ca, c0_ca = 1.0 - (ALPHA_CA + BETA_CA) * dt, ALPHA_CA * dt
    c1_hca, c0_hca = 1.0 - (ALPHA_HCA + BETA_HCA) * dt, ALPHA_HCA * dt

    params = jnp.stack([dt, c1_n, c0_n, c1_m, c0_m, c1_h, c0_h,
                        c1_ca, c0_ca, c1_hca, c0_hca], axis=0)    # (11, O_pad)
    params = jnp.broadcast_to(params[:, None, :], (11, batch_tile, O_pad))

    grid = (B_pad // batch_tile, T_pad // time_chunk)

    out = pl.pallas_call(
        hh_kernel,
        out_shape=jax.ShapeDtypeStruct((T_pad, B_pad, O_pad), f32),
        grid_spec=pltpu.PrefetchScalarGridSpec(
            num_scalar_prefetch=0,
            grid=grid,
            in_specs=[
                pl.BlockSpec((time_chunk, batch_tile, In_pad),
                             lambda b, t: (t, b, 0)),
                pl.BlockSpec((In_pad, O_pad), lambda b, t: (0, 0)),
                pl.BlockSpec((11, batch_tile, O_pad), lambda b, t: (0, 0, 0)),
            ],
            out_specs=pl.BlockSpec((time_chunk, batch_tile, O_pad),
                                   lambda b, t: (t, b, 0)),
            scratch_shapes=[pltpu.VMEM((6, batch_tile, O_pad), f32)],
        ),
        compiler_params=pltpu.CompilerParams(
            dimension_semantics=("parallel", "arbitrary")),
    )(x, w, params)

    # back to PyTorch batch-major [B, T, Out], drop padding
    return jnp.transpose(out[:T, :B, :O], (1, 0, 2))


def hh_neuron_reference(x_bti, w_oi, bias_o, dt_o, an, bn, am, bm, ah, bh):
    """Pure-JAX reference matching the PyTorch forward (for verification)."""
    B, T, In = x_bti.shape
    O = w_oi.shape[0]
    v = y = m = h = mCaL = hCa = jnp.zeros((B, O), jnp.float32)
    spikes = []
    for t in range(T):
        drive = x_bti[:, t, :] @ w_oi.T + bias_o
        g_Na = GBAR_NA * h * m ** 3
        g_K = GBAR_K * y ** 4
        g_Ca = GBAR_CA * mCaL ** 2 * hCa
        I_Na = g_Na * (v - V_NA)
        I_K = g_K * (v - V_K)
        I_L = GBAR_L * (v - V_L)
        I_Ca = g_Ca * (v - V_CA)
        v = v + (drive - I_Na - I_K - I_L - I_Ca) * dt_o
        y = y + (an * (1 - y) - bn * y) * dt_o
        m = m + (am * (1 - m) - bm * m) * dt_o
        h = h + (ah * (1 - h) - bh * h) * dt_o
        mCaL = mCaL + (ALPHA_CA * (1 - mCaL) - BETA_CA * mCaL) * dt_o
        hCa = hCa + (ALPHA_HCA * (1 - hCa) - BETA_HCA * hCa) * dt_o
        spikes.append((v - THRESH > 0).astype(jnp.float32))
    return jnp.stack(spikes, axis=1)


if __name__ == "__main__":
    # Small shapes consistent with the module's forward (wins=15 by default).
    B, T, IN, OUT = 2, 15, 32, 32

    key = jax.random.PRNGKey(0)
    kx, kw, kdt, kan, kbn, kam, kbm, kah, kbh = jax.random.split(key, 9)

    # Deterministic parameter init mirroring __init__:
    #   fc: xavier_uniform weight, zero bias
    bound = (6.0 / (IN + OUT)) ** 0.5
    w_oi = jax.random.uniform(kw, (OUT, IN), jnp.float32, -bound, bound)
    bias_o = jnp.zeros((OUT,), jnp.float32)
    #   dt = 0.1 * 2 * rand(out);  *_coe = 0.1 * rand(out)
    dt_o = 0.2 * jax.random.uniform(kdt, (OUT,), jnp.float32)
    an = 0.1 * jax.random.uniform(kan, (OUT,), jnp.float32)
    bn = 0.1 * jax.random.uniform(kbn, (OUT,), jnp.float32)
    am = 0.1 * jax.random.uniform(kam, (OUT,), jnp.float32)
    bm = 0.1 * jax.random.uniform(kbm, (OUT,), jnp.float32)
    ah = 0.1 * jax.random.uniform(kah, (OUT,), jnp.float32)
    bh = 0.1 * jax.random.uniform(kbh, (OUT,), jnp.float32)

    # Scaled inputs so the membrane potential actually crosses threshold and
    # the comparison against the reference exercises real spiking activity.
    x = 10.0 * jax.random.normal(kx, (B, T, IN), jnp.float32)

    spikes = hh_neuron_forward(x, w_oi, bias_o, dt_o, an, bn, am, bm, ah, bh)
    spikes = jax.block_until_ready(spikes)

    ref = hh_neuron_reference(x, w_oi, bias_o, dt_o, an, bn, am, bm, ah, bh)
    assert spikes.shape == (B, T, OUT)
    assert float(jnp.sum(spikes)) > 0.0, "test produced no spikes (too weak)"
    assert jnp.allclose(spikes, ref), "Pallas kernel mismatch vs JAX reference"

    print("KERNEL_OK")
</pallas_src>

<mosaic_0001>
module attributes {stable_mosaic.version = 11 : i64} {
  func.func @hh_kernel(%arg0: i32, %arg1: i32, %arg2: memref<16x8x128xf32, #tpu.memory_space<vmem>>, %arg3: memref<128x128xf32, #tpu.memory_space<vmem>>, %arg4: memref<11x8x128xf32, #tpu.memory_space<vmem>>, %arg5: memref<16x8x128xf32, #tpu.memory_space<vmem>>, %arg6: memref<6x8x128xf32, #tpu.memory_space<vmem>>) attributes {dimension_semantics = [#tpu.dimension_semantics<parallel>, #tpu.dimension_semantics<arbitrary>], iteration_bounds = array<i64: 1, 1>, scalar_prefetch = 0 : i64, scratch_operands = 1 : i64, tpu.core_type = #tpu.core_type<tc>, window_params = [{transform_indices = @transform_0, window_bounds = array<i64: 16, 8, 128>}, {pipeline_mode = #tpu.pipeline_mode<synchronous>, transform_indices = @transform_1, window_bounds = array<i64: 128, 128>}, {pipeline_mode = #tpu.pipeline_mode<synchronous>, transform_indices = @transform_2, window_bounds = array<i64: 11, 8, 128>}, {transform_indices = @transform_3, window_bounds = array<i64: 16, 8, 128>}]} {
    %c0_i32 = arith.constant 0 : i32
    %0 = arith.cmpi eq, %arg1, %c0_i32 : i32
    %1 = arith.extui %0 : i1 to i32
    %c0_i32_0 = arith.constant 0 : i32
    %2 = arith.cmpi ne, %1, %c0_i32_0 : i32
    scf.if %2 {
      %cst_267 = arith.constant 0.000000e+00 : f32
      %891 = vector.broadcast %cst_267 : f32 to vector<6x8x128xf32>
      %c0_268 = arith.constant 0 : index
      %c0_269 = arith.constant 0 : index
      %c0_270 = arith.constant 0 : index
      %892 = vector.load %arg6[%c0_268, %c0_269, %c0_270] : memref<6x8x128xf32, #tpu.memory_space<vmem>>, vector<6x8x128xf32>
      tpu.vector_store %arg6[%c0_268, %c0_269, %c0_270], %891 {strides = array<i32>} : memref<6x8x128xf32, #tpu.memory_space<vmem>>, vector<6x8x128xf32>,
    } else {
    }
    %c0 = arith.constant 0 : index
    %c0_1 = arith.constant 0 : index
    %c0_2 = arith.constant 0 : index
    %3 = vector.load %arg2[%c0, %c0_1, %c0_2] : memref<16x8x128xf32, #tpu.memory_space<vmem>>, vector<16x8x128xf32>
    %4 = vector.shape_cast %3 : vector<16x8x128xf32> to vector<128x128xf32>
    %c0_3 = arith.constant 0 : index
    %c0_4 = arith.constant 0 : index
    %5 = vector.load %arg3[%c0_3, %c0_4] : memref<128x128xf32, #tpu.memory_space<vmem>>, vector<128x128xf32>
    %cst = arith.constant dense<0.000000e+00> : vector<128x128xf32>
    %6 = tpu.matmul %4, %5, %cst {dimension_numbers = #tpu.dot_dimension_numbers<[1], [0], [0], [1], [0, 0, 1, 1], [], []>} : vector<128x128xf32>, vector<128x128xf32>, vector<128x128xf32> -> vector<128x128xf32>
    %c0_5 = arith.constant 0 : index
    %c0_6 = arith.constant 0 : index
    %c0_7 = arith.constant 0 : index
    %7 = vector.load %arg4[%c0_5, %c0_6, %c0_7] : memref<11x8x128xf32, #tpu.memory_space<vmem>>, vector<1x8x128xf32>
    %8 = vector.shape_cast %7 : vector<1x8x128xf32> to vector<8x128xf32>
    %c1 = arith.constant 1 : index
    %c0_8 = arith.constant 0 : index
    %c0_9 = arith.constant 0 : index
    %9 = vector.load %arg4[%c1, %c0_8, %c0_9] : memref<11x8x128xf32, #tpu.memory_space<vmem>>, vector<1x8x128xf32>
    %10 = vector.shape_cast %9 : vector<1x8x128xf32> to vector<8x128xf32>
    %c2 = arith.constant 2 : index
    %c0_10 = arith.constant 0 : index
    %c0_11 = arith.constant 0 : index
    %11 = vector.load %arg4[%c2, %c0_10, %c0_11] : memref<11x8x128xf32, #tpu.memory_space<vmem>>, vector<1x8x128xf32>
    %12 = vector.shape_cast %11 : vector<1x8x128xf32> to vector<8x128xf32>
    %c3 = arith.constant 3 : index
    %c0_12 = arith.constant 0 : index
    %c0_13 = arith.constant 0 : index
    %13 = vector.load %arg4[%c3, %c0_12, %c0_13] : memref<11x8x128xf32, #tpu.memory_space<vmem>>, vector<1x8x128xf32>
    %14 = vector.shape_cast %13 : vector<1x8x128xf32> to vector<8x128xf32>
    %c4 = arith.constant 4 : index
    %c0_14 = arith.constant 0 : index
    %c0_15 = arith.constant 0 : index
    %15 = vector.load %arg4[%c4, %c0_14, %c0_15] : memref<11x8x128xf32, #tpu.memory_space<vmem>>, vector<1x8x128xf32>
    %16 = vector.shape_cast %15 : vector<1x8x128xf32> to vector<8x128xf32>
    %c5 = arith.constant 5 : index
    %c0_16 = arith.constant 0 : index
    %c0_17 = arith.constant 0 : index
    %17 = vector.load %arg4[%c5, %c0_16, %c0_17] : memref<11x8x128xf32, #tpu.memory_space<vmem>>, vector<1x8x128xf32>
    %18 = vector.shape_cast %17 : vector<1x8x128xf32> to vector<8x128xf32>
    %c6 = arith.constant 6 : index
    %c0_18 = arith.constant 0 : index
    %c0_19 = arith.constant 0 : index
    %19 = vector.load %arg4[%c6, %c0_18, %c0_19] : memref<11x8x128xf32, #tpu.memory_space<vmem>>, vector<1x8x128xf32>
    %20 = vector.shape_cast %19 : vector<1x8x128xf32> to vector<8x128xf32>
    %c7 = arith.constant 7 : index
    %c0_20 = arith.constant 0 : index
    %c0_21 = arith.constant 0 : index
    %21 = vector.load %arg4[%c7, %c0_20, %c0_21] : memref<11x8x128xf32, #tpu.memory_space<vmem>>, vector<1x8x128xf32>
    %22 = vector.shape_cast %21 : vector<1x8x128xf32> to vector<8x128xf32>
    %c8 = arith.constant 8 : index
    %c0_22 = arith.constant 0 : index
    %c0_23 = arith.constant 0 : index
    %23 = vector.load %arg4[%c8, %c0_22, %c0_23] : memref<11x8x128xf32, #tpu.memory_space<vmem>>, vector<1x8x128xf32>
    %24 = vector.shape_cast %23 : vector<1x8x128xf32> to vector<8x128xf32>
    %c9 = arith.constant 9 : index
    %c0_24 = arith.constant 0 : index
    %c0_25 = arith.constant 0 : index
    %25 = vector.load %arg4[%c9, %c0_24, %c0_25] : memref<11x8x128xf32, #tpu.memory_space<vmem>>, vector<1x8x128xf32>
    %26 = vector.shape_cast %25 : vector<1x8x128xf32> to vector<8x128xf32>
    %c10 = arith.constant 10 : index
    %c0_26 = arith.constant 0 : index
    %c0_27 = arith.constant 0 : index
    %27 = vector.load %arg4[%c10, %c0_26, %c0_27] : memref<11x8x128xf32, #tpu.memory_space<vmem>>, vector<1x8x128xf32>
    %28 = vector.shape_cast %27 : vector<1x8x128xf32> to vector<8x128xf32>
    %c0_28 = arith.constant 0 : index
    %c0_29 = arith.constant 0 : index
    %c0_30 = arith.constant 0 : index
    %29 = vector.load %arg6[%c0_28, %c0_29, %c0_30] : memref<6x8x128xf32, #tpu.memory_space<vmem>>, vector<1x8x128xf32>
    %30 = vector.shape_cast %29 : vector<1x8x128xf32> to vector<8x128xf32>
    %c1_31 = arith.constant 1 : index
    %c0_32 = arith.constant 0 : index
    %c0_33 = arith.constant 0 : index
    %31 = vector.load %arg6[%c1_31, %c0_32, %c0_33] : memref<6x8x128xf32, #tpu.memory_space<vmem>>, vector<1x8x128xf32>
    %32 = vector.shape_cast %31 : vector<1x8x128xf32> to vector<8x128xf32>
    %c2_34 = arith.constant 2 : index
    %c0_35 = arith.constant 0 : index
    %c0_36 = arith.constant 0 : index
    %33 = vector.load %arg6[%c2_34, %c0_35, %c0_36] : memref<6x8x128xf32, #tpu.memory_space<vmem>>, vector<1x8x128xf32>
    %34 = vector.shape_cast %33 : vector<1x8x128xf32> to vector<8x128xf32>
    %c3_37 = arith.constant 3 : index
    %c0_38 = arith.constant 0 : index
    %c0_39 = arith.constant 0 : index
    %35 = vector.load %arg6[%c3_37, %c0_38, %c0_39] : memref<6x8x128xf32, #tpu.memory_space<vmem>>, vector<1x8x128xf32>
    %36 = vector.shape_cast %35 : vector<1x8x128xf32> to vector<8x128xf32>
    %c4_40 = arith.constant 4 : index
    %c0_41 = arith.constant 0 : index
    %c0_42 = arith.constant 0 : index
    %37 = vector.load %arg6[%c4_40, %c0_41, %c0_42] : memref<6x8x128xf32, #tpu.memory_space<vmem>>, vector<1x8x128xf32>
    %38 = vector.shape_cast %37 : vector<1x8x128xf32> to vector<8x128xf32>
    %c5_43 = arith.constant 5 : index
    %c0_44 = arith.constant 0 : index
    %c0_45 = arith.constant 0 : index
    %39 = vector.load %arg6[%c5_43, %c0_44, %c0_45] : memref<6x8x128xf32, #tpu.memory_space<vmem>>, vector<1x8x128xf32>
    %40 = vector.shape_cast %39 : vector<1x8x128xf32> to vector<8x128xf32>
    %41 = vector.extract_strided_slice %6 {offsets = [0, 0], sizes = [8, 128], strides = [1, 1]} : vector<128x128xf32> to vector<8x128xf32>
    %cst_46 = arith.constant 1.200000e+02 : f32
    %42 = vector.broadcast %cst_46 : f32 to vector<8x128xf32>
    %43 = arith.mulf %42, %36 : vector<8x128xf32>
    %44 = arith.mulf %34, %34 : vector<8x128xf32>
    %45 = arith.mulf %44, %34 : vector<8x128xf32>
    %46 = arith.mulf %43, %45 : vector<8x128xf32>
    %47 = arith.mulf %32, %32 : vector<8x128xf32>
    %48 = arith.mulf %47, %47 : vector<8x128xf32>
    %cst_47 = arith.constant 3.600000e+01 : f32
    %49 = vector.broadcast %cst_47 : f32 to vector<8x128xf32>
    %50 = arith.mulf %49, %48 : vector<8x128xf32>
    %cst_48 = arith.constant 1.000000e-01 : f32
    %51 = vector.broadcast %cst_48 : f32 to vector<8x128xf32>
    %52 = arith.mulf %51, %40 : vector<8x128xf32>
    %53 = arith.mulf %38, %38 : vector<8x128xf32>
    %54 = arith.mulf %52, %53 : vector<8x128xf32>
    %cst_49 = arith.constant 1.150000e+02 : f32
    %55 = vector.broadcast %cst_49 : f32 to vector<8x128xf32>
    %56 = arith.subf %30, %55 : vector<8x128xf32>
    %57 = arith.mulf %46, %56 : vector<8x128xf32>
    %cst_50 = arith.constant -1.200000e+01 : f32
    %58 = vector.broadcast %cst_50 : f32 to vector<8x128xf32>
    %59 = arith.subf %30, %58 : vector<8x128xf32>
    %60 = arith.mulf %50, %59 : vector<8x128xf32>
    %cst_51 = arith.constant 1.060000e+01 : f32
    %61 = vector.broadcast %cst_51 : f32 to vector<8x128xf32>
    %62 = arith.subf %30, %61 : vector<8x128xf32>
    %cst_52 = arith.constant 3.000000e-01 : f32
    %63 = vector.broadcast %cst_52 : f32 to vector<8x128xf32>
    %64 = arith.mulf %63, %62 : vector<8x128xf32>
    %cst_53 = arith.constant 1.200000e+02 : f32
    %65 = vector.broadcast %cst_53 : f32 to vector<8x128xf32>
    %66 = arith.subf %30, %65 : vector<8x128xf32>
    %67 = arith.mulf %54, %66 : vector<8x128xf32>
    %68 = arith.subf %41, %57 : vector<8x128xf32>
    %69 = arith.subf %68, %60 : vector<8x128xf32>
    %70 = arith.subf %69, %64 : vector<8x128xf32>
    %71 = arith.subf %70, %67 : vector<8x128xf32>
    %72 = arith.mulf %71, %8 : vector<8x128xf32>
    %73 = arith.addf %30, %72 : vector<8x128xf32>
    %74 = arith.mulf %32, %10 : vector<8x128xf32>
    %75 = arith.addf %74, %12 : vector<8x128xf32>
    %76 = arith.mulf %34, %14 : vector<8x128xf32>
    %77 = arith.addf %76, %16 : vector<8x128xf32>
    %78 = arith.mulf %36, %18 : vector<8x128xf32>
    %79 = arith.addf %78, %20 : vector<8x128xf32>
    %80 = arith.mulf %38, %22 : vector<8x128xf32>
    %81 = arith.addf %80, %24 : vector<8x128xf32>
    %82 = arith.mulf %40, %26 : vector<8x128xf32>
    %83 = arith.addf %82, %28 : vector<8x128xf32>
    %cst_54 = arith.constant 2.000000e+00 : f32
    %84 = vector.broadcast %cst_54 : f32 to vector<8x128xf32>
    %85 = arith.subf %73, %84 : vector<8x128xf32>
    %cst_55 = arith.constant 0.000000e+00 : f32
    %86 = vector.broadcast %cst_55 : f32 to vector<8x128xf32>
    %87 = arith.cmpf ogt, %85, %86 : vector<8x128xf32>
    %88 = arith.extui %87 : vector<8x128xi1> to vector<8x128xi32>
    %89 = arith.sitofp %88 : vector<8x128xi32> to vector<8x128xf32>
    %c0_56 = arith.constant 0 : index
    %c0_57 = arith.constant 0 : index
    %c0_58 = arith.constant 0 : index
    %90 = vector.load %arg5[%c0_56, %c0_57, %c0_58] : memref<16x8x128xf32, #tpu.memory_space<vmem>>, vector<1x8x128xf32>
    %91 = vector.shape_cast %90 : vector<1x8x128xf32> to vector<8x128xf32>
    %92 = vector.shape_cast %89 : vector<8x128xf32> to vector<1x8x128xf32>
    tpu.vector_store %arg5[%c0_56, %c0_57, %c0_58], %92 {strides = array<i32>} : memref<16x8x128xf32, #tpu.memory_space<vmem>>, vector<1x8x128xf32>,
    %93 = vector.extract_strided_slice %6 {offsets = [8, 0], sizes = [8, 128], strides = [1, 1]} : vector<128x128xf32> to vector<8x128xf32>
    %cst_59 = arith.constant 1.200000e+02 : f32
    %94 = vector.broadcast %cst_59 : f32 to vector<8x128xf32>
    %95 = arith.mulf %94, %79 : vector<8x128xf32>
    %96 = arith.mulf %77, %77 : vector<8x128xf32>
    %97 = arith.mulf %96, %77 : vector<8x128xf32>
    %98 = arith.mulf %95, %97 : vector<8x128xf32>
    %99 = arith.mulf %75, %75 : vector<8x128xf32>
    %100 = arith.mulf %99, %99 : vector<8x128xf32>
    %cst_60 = arith.constant 3.600000e+01 : f32
    %101 = vector.broadcast %cst_60 : f32 to vector<8x128xf32>
    %102 = arith.mulf %101, %100 : vector<8x128xf32>
    %cst_61 = arith.constant 1.000000e-01 : f32
    %103 = vector.broadcast %cst_61 : f32 to vector<8x128xf32>
    %104 = arith.mulf %103, %83 : vector<8x128xf32>
    %105 = arith.mulf %81, %81 : vector<8x128xf32>
    %106 = arith.mulf %104, %105 : vector<8x128xf32>
    %cst_62 = arith.constant 1.150000e+02 : f32
    %107 = vector.broadcast %cst_62 : f32 to vector<8x128xf32>
    %108 = arith.subf %73, %107 : vector<8x128xf32>
    %109 = arith.mulf %98, %108 : vector<8x128xf32>
    %cst_63 = arith.constant -1.200000e+01 : f32
    %110 = vector.broadcast %cst_63 : f32 to vector<8x128xf32>
    %111 = arith.subf %73, %110 : vector<8x128xf32>
    %112 = arith.mulf %102, %111 : vector<8x128xf32>
    %cst_64 = arith.constant 1.060000e+01 : f32
    %113 = vector.broadcast %cst_64 : f32 to vector<8x128xf32>
    %114 = arith.subf %73, %113 : vector<8x128xf32>
    %cst_65 = arith.constant 3.000000e-01 : f32
    %115 = vector.broadcast %cst_65 : f32 to vector<8x128xf32>
    %116 = arith.mulf %115, %114 : vector<8x128xf32>
    %cst_66 = arith.constant 1.200000e+02 : f32
    %117 = vector.broadcast %cst_66 : f32 to vector<8x128xf32>
    %118 = arith.subf %73, %117 : vector<8x128xf32>
    %119 = arith.mulf %106, %118 : vector<8x128xf32>
    %120 = arith.subf %93, %109 : vector<8x128xf32>
    %121 = arith.subf %120, %112 : vector<8x128xf32>
    %122 = arith.subf %121, %116 : vector<8x128xf32>
    %123 = arith.subf %122, %119 : vector<8x128xf32>
    %124 = arith.mulf %123, %8 : vector<8x128xf32>
    %125 = arith.addf %73, %124 : vector<8x128xf32>
    %126 = arith.mulf %75, %10 : vector<8x128xf32>
    %127 = arith.addf %126, %12 : vector<8x128xf32>
    %128 = arith.mulf %77, %14 : vector<8x128xf32>
    %129 = arith.addf %128, %16 : vector<8x128xf32>
    %130 = arith.mulf %79, %18 : vector<8x128xf32>
    %131 = arith.addf %130, %20 : vector<8x128xf32>
    %132 = arith.mulf %81, %22 : vector<8x128xf32>
    %133 = arith.addf %132, %24 : vector<8x128xf32>
    %134 = arith.mulf %83, %26 : vector<8x128xf32>
    %135 = arith.addf %134, %28 : vector<8x128xf32>
    %cst_67 = arith.constant 2.000000e+00 : f32
    %136 = vector.broadcast %cst_67 : f32 to vector<8x128xf32>
    %137 = arith.subf %125, %136 : vector<8x128xf32>
    %cst_68 = arith.constant 0.000000e+00 : f32
    %138 = vector.broadcast %cst_68 : f32 to vector<8x128xf32>
    %139 = arith.cmpf ogt, %137, %138 : vector<8x128xf32>
    %140 = arith.extui %139 : vector<8x128xi1> to vector<8x128xi32>
    %141 = arith.sitofp %140 : vector<8x128xi32> to vector<8x128xf32>
    %c1_69 = arith.constant 1 : index
    %c0_70 = arith.constant 0 : index
    %c0_71 = arith.constant 0 : index
    %142 = vector.load %arg5[%c1_69, %c0_70, %c0_71] : memref<16x8x128xf32, #tpu.memory_space<vmem>>, vector<1x8x128xf32>
    %143 = vector.shape_cast %142 : vector<1x8x128xf32> to vector<8x128xf32>
    %144 = vector.shape_cast %141 : vector<8x128xf32> to vector<1x8x128xf32>
    tpu.vector_store %arg5[%c1_69, %c0_70, %c0_71], %144 {strides = array<i32>} : memref<16x8x128xf32, #tpu.memory_space<vmem>>, vector<1x8x128xf32>,
    %145 = vector.extract_strided_slice %6 {offsets = [16, 0], sizes = [8, 128], strides = [1, 1]} : vector<128x128xf32> to vector<8x128xf32>
    %cst_72 = arith.constant 1.200000e+02 : f32
    %146 = vector.broadcast %cst_72 : f32 to vector<8x128xf32>
    %147 = arith.mulf %146, %131 : vector<8x128xf32>
    %148 = arith.mulf %129, %129 : vector<8x128xf32>
    %149 = arith.mulf %148, %129 : vector<8x128xf32>
    %150 = arith.mulf %147, %149 : vector<8x128xf32>
    %151 = arith.mulf %127, %127 : vector<8x128xf32>
    %152 = arith.mulf %151, %151 : vector<8x128xf32>
    %cst_73 = arith.constant 3.600000e+01 : f32
    %153 = vector.broadcast %cst_73 : f32 to vector<8x128xf32>
    %154 = arith.mulf %153, %152 : vector<8x128xf32>
    %cst_74 = arith.constant 1.000000e-01 : f32
    %155 = vector.broadcast %cst_74 : f32 to vector<8x128xf32>
    %156 = arith.mulf %155, %135 : vector<8x128xf32>
    %157 = arith.mulf %133, %133 : vector<8x128xf32>
    %158 = arith.mulf %156, %157 : vector<8x128xf32>
    %cst_75 = arith.constant 1.150000e+02 : f32
    %159 = vector.broadcast %cst_75 : f32 to vector<8x128xf32>
    %160 = arith.subf %125, %159 : vector<8x128xf32>
    %161 = arith.mulf %150, %160 : vector<8x128xf32>
    %cst_76 = arith.constant -1.200000e+01 : f32
    %162 = vector.broadcast %cst_76 : f32 to vector<8x128xf32>
    %163 = arith.subf %125, %162 : vector<8x128xf32>
    %164 = arith.mulf %154, %163 : vector<8x128xf32>
    %cst_77 = arith.constant 1.060000e+01 : f32
    %165 = vector.broadcast %cst_77 : f32 to vector<8x128xf32>
    %166 = arith.subf %125, %165 : vector<8x128xf32>
    %cst_78 = arith.constant 3.000000e-01 : f32
    %167 = vector.broadcast %cst_78 : f32 to vector<8x128xf32>
    %168 = arith.mulf %167, %166 : vector<8x128xf32>
    %cst_79 = arith.constant 1.200000e+02 : f32
    %169 = vector.broadcast %cst_79 : f32 to vector<8x128xf32>
    %170 = arith.subf %125, %169 : vector<8x128xf32>
    %171 = arith.mulf %158, %170 : vector<8x128xf32>
    %172 = arith.subf %145, %161 : vector<8x128xf32>
    %173 = arith.subf %172, %164 : vector<8x128xf32>
    %174 = arith.subf %173, %168 : vector<8x128xf32>
    %175 = arith.subf %174, %171 : vector<8x128xf32>
    %176 = arith.mulf %175, %8 : vector<8x128xf32>
    %177 = arith.addf %125, %176 : vector<8x128xf32>
    %178 = arith.mulf %127, %10 : vector<8x128xf32>
    %179 = arith.addf %178, %12 : vector<8x128xf32>
    %180 = arith.mulf %129, %14 : vector<8x128xf32>
    %181 = arith.addf %180, %16 : vector<8x128xf32>
    %182 = arith.mulf %131, %18 : vector<8x128xf32>
    %183 = arith.addf %182, %20 : vector<8x128xf32>
    %184 = arith.mulf %133, %22 : vector<8x128xf32>
    %185 = arith.addf %184, %24 : vector<8x128xf32>
    %186 = arith.mulf %135, %26 : vector<8x128xf32>
    %187 = arith.addf %186, %28 : vector<8x128xf32>
    %cst_80 = arith.constant 2.000000e+00 : f32
    %188 = vector.broadcast %cst_80 : f32 to vector<8x128xf32>
    %189 = arith.subf %177, %188 : vector<8x128xf32>
    %cst_81 = arith.constant 0.000000e+00 : f32
    %190 = vector.broadcast %cst_81 : f32 to vector<8x128xf32>
    %191 = arith.cmpf ogt, %189, %190 : vector<8x128xf32>
    %192 = arith.extui %191 : vector<8x128xi1> to vector<8x128xi32>
    %193 = arith.sitofp %192 : vector<8x128xi32> to vector<8x128xf32>
    %c2_82 = arith.constant 2 : index
    %c0_83 = arith.constant 0 : index
    %c0_84 = arith.constant 0 : index
    %194 = vector.load %arg5[%c2_82, %c0_83, %c0_84] : memref<16x8x128xf32, #tpu.memory_space<vmem>>, vector<1x8x128xf32>
    %195 = vector.shape_cast %194 : vector<1x8x128xf32> to vector<8x128xf32>
    %196 = vector.shape_cast %193 : vector<8x128xf32> to vector<1x8x128xf32>
    tpu.vector_store %arg5[%c2_82, %c0_83, %c0_84], %196 {strides = array<i32>} : memref<16x8x128xf32, #tpu.memory_space<vmem>>, vector<1x8x128xf32>,
    %197 = vector.extract_strided_slice %6 {offsets = [24, 0], sizes = [8, 128], strides = [1, 1]} : vector<128x128xf32> to vector<8x128xf32>
    %cst_85 = arith.constant 1.200000e+02 : f32
    %198 = vector.broadcast %cst_85 : f32 to vector<8x128xf32>
    %199 = arith.mulf %198, %183 : vector<8x128xf32>
    %200 = arith.mulf %181, %181 : vector<8x128xf32>
    %201 = arith.mulf %200, %181 : vector<8x128xf32>
    %202 = arith.mulf %199, %201 : vector<8x128xf32>
    %203 = arith.mulf %179, %179 : vector<8x128xf32>
    %204 = arith.mulf %203, %203 : vector<8x128xf32>
    %cst_86 = arith.constant 3.600000e+01 : f32
    %205 = vector.broadcast %cst_86 : f32 to vector<8x128xf32>
    %206 = arith.mulf %205, %204 : vector<8x128xf32>
    %cst_87 = arith.constant 1.000000e-01 : f32
    %207 = vector.broadcast %cst_87 : f32 to vector<8x128xf32>
    %208 = arith.mulf %207, %187 : vector<8x128xf32>
    %209 = arith.mulf %185, %185 : vector<8x128xf32>
    %210 = arith.mulf %208, %209 : vector<8x128xf32>
    %cst_88 = arith.constant 1.150000e+02 : f32
    %211 = vector.broadcast %cst_88 : f32 to vector<8x128xf32>
    %212 = arith.subf %177, %211 : vector<8x128xf32>
    %213 = arith.mulf %202, %212 : vector<8x128xf32>
    %cst_89 = arith.constant -1.200000e+01 : f32
    %214 = vector.broadcast %cst_89 : f32 to vector<8x128xf32>
    %215 = arith.subf %177, %214 : vector<8x128xf32>
    %216 = arith.mulf %206, %215 : vector<8x128xf32>
    %cst_90 = arith.constant 1.060000e+01 : f32
    %217 = vector.broadcast %cst_90 : f32 to vector<8x128xf32>
    %218 = arith.subf %177, %217 : vector<8x128xf32>
    %cst_91 = arith.constant 3.000000e-01 : f32
    %219 = vector.broadcast %cst_91 : f32 to vector<8x128xf32>
    %220 = arith.mulf %219, %218 : vector<8x128xf32>
    %cst_92 = arith.constant 1.200000e+02 : f32
    %221 = vector.broadcast %cst_92 : f32 to vector<8x128xf32>
    %222 = arith.subf %177, %221 : vector<8x128xf32>
    %223 = arith.mulf %210, %222 : vector<8x128xf32>
    %224 = arith.subf %197, %213 : vector<8x128xf32>
    %225 = arith.subf %224, %216 : vector<8x128xf32>
    %226 = arith.subf %225, %220 : vector<8x128xf32>
    %227 = arith.subf %226, %223 : vector<8x128xf32>
    %228 = arith.mulf %227, %8 : vector<8x128xf32>
    %229 = arith.addf %177, %228 : vector<8x128xf32>
    %230 = arith.mulf %179, %10 : vector<8x128xf32>
    %231 = arith.addf %230, %12 : vector<8x128xf32>
    %232 = arith.mulf %181, %14 : vector<8x128xf32>
    %233 = arith.addf %232, %16 : vector<8x128xf32>
    %234 = arith.mulf %183, %18 : vector<8x128xf32>
    %235 = arith.addf %234, %20 : vector<8x128xf32>
    %236 = arith.mulf %185, %22 : vector<8x128xf32>
    %237 = arith.addf %236, %24 : vector<8x128xf32>
    %238 = arith.mulf %187, %26 : vector<8x128xf32>
    %239 = arith.addf %238, %28 : vector<8x128xf32>
    %cst_93 = arith.constant 2.000000e+00 : f32
    %240 = vector.broadcast %cst_93 : f32 to vector<8x128xf32>
    %241 = arith.subf %229, %240 : vector<8x128xf32>
    %cst_94 = arith.constant 0.000000e+00 : f32
    %242 = vector.broadcast %cst_94 : f32 to vector<8x128xf32>
    %243 = arith.cmpf ogt, %241, %242 : vector<8x128xf32>
    %244 = arith.extui %243 : vector<8x128xi1> to vector<8x128xi32>
    %245 = arith.sitofp %244 : vector<8x128xi32> to vector<8x128xf32>
    %c3_95 = arith.constant 3 : index
    %c0_96 = arith.constant 0 : index
    %c0_97 = arith.constant 0 : index
    %246 = vector.load %arg5[%c3_95, %c0_96, %c0_97] : memref<16x8x128xf32, #tpu.memory_space<vmem>>, vector<1x8x128xf32>
    %247 = vector.shape_cast %246 : vector<1x8x128xf32> to vector<8x128xf32>
    %248 = vector.shape_cast %245 : vector<8x128xf32> to vector<1x8x128xf32>
    tpu.vector_store %arg5[%c3_95, %c0_96, %c0_97], %248 {strides = array<i32>} : memref<16x8x128xf32, #tpu.memory_space<vmem>>, vector<1x8x128xf32>,
    %249 = vector.extract_strided_slice %6 {offsets = [32, 0], sizes = [8, 128], strides = [1, 1]} : vector<128x128xf32> to vector<8x128xf32>
    %cst_98 = arith.constant 1.200000e+02 : f32
    %250 = vector.broadcast %cst_98 : f32 to vector<8x128xf32>
    %251 = arith.mulf %250, %235 : vector<8x128xf32>
    %252 = arith.mulf %233, %233 : vector<8x128xf32>
    %253 = arith.mulf %252, %233 : vector<8x128xf32>
    %254 = arith.mulf %251, %253 : vector<8x128xf32>
    %255 = arith.mulf %231, %231 : vector<8x128xf32>
    %256 = arith.mulf %255, %255 : vector<8x128xf32>
    %cst_99 = arith.constant 3.600000e+01 : f32
    %257 = vector.broadcast %cst_99 : f32 to vector<8x128xf32>
    %258 = arith.mulf %257, %256 : vector<8x128xf32>
    %cst_100 = arith.constant 1.000000e-01 : f32
    %259 = vector.broadcast %cst_100 : f32 to vector<8x128xf32>
    %260 = arith.mulf %259, %239 : vector<8x128xf32>
    %261 = arith.mulf %237, %237 : vector<8x128xf32>
    %262 = arith.mulf %260, %261 : vector<8x128xf32>
    %cst_101 = arith.constant 1.150000e+02 : f32
    %263 = vector.broadcast %cst_101 : f32 to vector<8x128xf32>
    %264 = arith.subf %229, %263 : vector<8x128xf32>
    %265 = arith.mulf %254, %264 : vector<8x128xf32>
    %cst_102 = arith.constant -1.200000e+01 : f32
    %266 = vector.broadcast %cst_102 : f32 to vector<8x128xf32>
    %267 = arith.subf %229, %266 : vector<8x128xf32>
    %268 = arith.mulf %258, %267 : vector<8x128xf32>
    %cst_103 = arith.constant 1.060000e+01 : f32
    %269 = vector.broadcast %cst_103 : f32 to vector<8x128xf32>
    %270 = arith.subf %229, %269 : vector<8x128xf32>
    %cst_104 = arith.constant 3.000000e-01 : f32
    %271 = vector.broadcast %cst_104 : f32 to vector<8x128xf32>
    %272 = arith.mulf %271, %270 : vector<8x128xf32>
    %cst_105 = arith.constant 1.200000e+02 : f32
    %273 = vector.broadcast %cst_105 : f32 to vector<8x128xf32>
    %274 = arith.subf %229, %273 : vector<8x128xf32>
    %275 = arith.mulf %262, %274 : vector<8x128xf32>
    %276 = arith.subf %249, %265 : vector<8x128xf32>
    %277 = arith.subf %276, %268 : vector<8x128xf32>
    %278 = arith.subf %277, %272 : vector<8x128xf32>
    %279 = arith.subf %278, %275 : vector<8x128xf32>
    %280 = arith.mulf %279, %8 : vector<8x128xf32>
    %281 = arith.addf %229, %280 : vector<8x128xf32>
    %282 = arith.mulf %231, %10 : vector<8x128xf32>
    %283 = arith.addf %282, %12 : vector<8x128xf32>
    %284 = arith.mulf %233, %14 : vector<8x128xf32>
    %285 = arith.addf %284, %16 : vector<8x128xf32>
    %286 = arith.mulf %235, %18 : vector<8x128xf32>
    %287 = arith.addf %286, %20 : vector<8x128xf32>
    %288 = arith.mulf %237, %22 : vector<8x128xf32>
    %289 = arith.addf %288, %24 : vector<8x128xf32>
    %290 = arith.mulf %239, %26 : vector<8x128xf32>
    %291 = arith.addf %290, %28 : vector<8x128xf32>
    %cst_106 = arith.constant 2.000000e+00 : f32
    %292 = vector.broadcast %cst_106 : f32 to vector<8x128xf32>
    %293 = arith.subf %281, %292 : vector<8x128xf32>
    %cst_107 = arith.constant 0.000000e+00 : f32
    %294 = vector.broadcast %cst_107 : f32 to vector<8x128xf32>
    %295 = arith.cmpf ogt, %293, %294 : vector<8x128xf32>
    %296 = arith.extui %295 : vector<8x128xi1> to vector<8x128xi32>
    %297 = arith.sitofp %296 : vector<8x128xi32> to vector<8x128xf32>
    %c4_108 = arith.constant 4 : index
    %c0_109 = arith.constant 0 : index
    %c0_110 = arith.constant 0 : index
    %298 = vector.load %arg5[%c4_108, %c0_109, %c0_110] : memref<16x8x128xf32, #tpu.memory_space<vmem>>, vector<1x8x128xf32>
    %299 = vector.shape_cast %298 : vector<1x8x128xf32> to vector<8x128xf32>
    %300 = vector.shape_cast %297 : vector<8x128xf32> to vector<1x8x128xf32>
    tpu.vector_store %arg5[%c4_108, %c0_109, %c0_110], %300 {strides = array<i32>} : memref<16x8x128xf32, #tpu.memory_space<vmem>>, vector<1x8x128xf32>,
    %301 = vector.extract_strided_slice %6 {offsets = [40, 0], sizes = [8, 128], strides = [1, 1]} : vector<128x128xf32> to vector<8x128xf32>
    %cst_111 = arith.constant 1.200000e+02 : f32
    %302 = vector.broadcast %cst_111 : f32 to vector<8x128xf32>
    %303 = arith.mulf %302, %287 : vector<8x128xf32>
    %304 = arith.mulf %285, %285 : vector<8x128xf32>
    %305 = arith.mulf %304, %285 : vector<8x128xf32>
    %306 = arith.mulf %303, %305 : vector<8x128xf32>
    %307 = arith.mulf %283, %283 : vector<8x128xf32>
    %308 = arith.mulf %307, %307 : vector<8x128xf32>
    %cst_112 = arith.constant 3.600000e+01 : f32
    %309 = vector.broadcast %cst_112 : f32 to vector<8x128xf32>
    %310 = arith.mulf %309, %308 : vector<8x128xf32>
    %cst_113 = arith.constant 1.000000e-01 : f32
    %311 = vector.broadcast %cst_113 : f32 to vector<8x128xf32>
    %312 = arith.mulf %311, %291 : vector<8x128xf32>
    %313 = arith.mulf %289, %289 : vector<8x128xf32>
    %314 = arith.mulf %312, %313 : vector<8x128xf32>
    %cst_114 = arith.constant 1.150000e+02 : f32
    %315 = vector.broadcast %cst_114 : f32 to vector<8x128xf32>
    %316 = arith.subf %281, %315 : vector<8x128xf32>
    %317 = arith.mulf %306, %316 : vector<8x128xf32>
    %cst_115 = arith.constant -1.200000e+01 : f32
    %318 = vector.broadcast %cst_115 : f32 to vector<8x128xf32>
    %319 = arith.subf %281, %318 : vector<8x128xf32>
    %320 = arith.mulf %310, %319 : vector<8x128xf32>
    %cst_116 = arith.constant 1.060000e+01 : f32
    %321 = vector.broadcast %cst_116 : f32 to vector<8x128xf32>
    %322 = arith.subf %281, %321 : vector<8x128xf32>
    %cst_117 = arith.constant 3.000000e-01 : f32
    %323 = vector.broadcast %cst_117 : f32 to vector<8x128xf32>
    %324 = arith.mulf %323, %322 : vector<8x128xf32>
    %cst_118 = arith.constant 1.200000e+02 : f32
    %325 = vector.broadcast %cst_118 : f32 to vector<8x128xf32>
    %326 = arith.subf %281, %325 : vector<8x128xf32>
    %327 = arith.mulf %314, %326 : vector<8x128xf32>
    %328 = arith.subf %301, %317 : vector<8x128xf32>
    %329 = arith.subf %328, %320 : vector<8x128xf32>
    %330 = arith.subf %329, %324 : vector<8x128xf32>
    %331 = arith.subf %330, %327 : vector<8x128xf32>
    %332 = arith.mulf %331, %8 : vector<8x128xf32>
    %333 = arith.addf %281, %332 : vector<8x128xf32>
    %334 = arith.mulf %283, %10 : vector<8x128xf32>
    %335 = arith.addf %334, %12 : vector<8x128xf32>
    %336 = arith.mulf %285, %14 : vector<8x128xf32>
    %337 = arith.addf %336, %16 : vector<8x128xf32>
    %338 = arith.mulf %287, %18 : vector<8x128xf32>
    %339 = arith.addf %338, %20 : vector<8x128xf32>
    %340 = arith.mulf %289, %22 : vector<8x128xf32>
    %341 = arith.addf %340, %24 : vector<8x128xf32>
    %342 = arith.mulf %291, %26 : vector<8x128xf32>
    %343 = arith.addf %342, %28 : vector<8x128xf32>
    %cst_119 = arith.constant 2.000000e+00 : f32
    %344 = vector.broadcast %cst_119 : f32 to vector<8x128xf32>
    %345 = arith.subf %333, %344 : vector<8x128xf32>
    %cst_120 = arith.constant 0.000000e+00 : f32
    %346 = vector.broadcast %cst_120 : f32 to vector<8x128xf32>
    %347 = arith.cmpf ogt, %345, %346 : vector<8x128xf32>
    %348 = arith.extui %347 : vector<8x128xi1> to vector<8x128xi32>
    %349 = arith.sitofp %348 : vector<8x128xi32> to vector<8x128xf32>
    %c5_121 = arith.constant 5 : index
    %c0_122 = arith.constant 0 : index
    %c0_123 = arith.constant 0 : index
    %350 = vector.load %arg5[%c5_121, %c0_122, %c0_123] : memref<16x8x128xf32, #tpu.memory_space<vmem>>, vector<1x8x128xf32>
    %351 = vector.shape_cast %350 : vector<1x8x128xf32> to vector<8x128xf32>
    %352 = vector.shape_cast %349 : vector<8x128xf32> to vector<1x8x128xf32>
    tpu.vector_store %arg5[%c5_121, %c0_122, %c0_123], %352 {strides = array<i32>} : memref<16x8x128xf32, #tpu.memory_space<vmem>>, vector<1x8x128xf32>,
    %353 = vector.extract_strided_slice %6 {offsets = [48, 0], sizes = [8, 128], strides = [1, 1]} : vector<128x128xf32> to vector<8x128xf32>
    %cst_124 = arith.constant 1.200000e+02 : f32
    %354 = vector.broadcast %cst_124 : f32 to vector<8x128xf32>
    %355 = arith.mulf %354, %339 : vector<8x128xf32>
    %356 = arith.mulf %337, %337 : vector<8x128xf32>
    %357 = arith.mulf %356, %337 : vector<8x128xf32>
    %358 = arith.mulf %355, %357 : vector<8x128xf32>
    %359 = arith.mulf %335, %335 : vector<8x128xf32>
    %360 = arith.mulf %359, %359 : vector<8x128xf32>
    %cst_125 = arith.constant 3.600000e+01 : f32
    %361 = vector.broadcast %cst_125 : f32 to vector<8x128xf32>
    %362 = arith.mulf %361, %360 : vector<8x128xf32>
    %cst_126 = arith.constant 1.000000e-01 : f32
    %363 = vector.broadcast %cst_126 : f32 to vector<8x128xf32>
    %364 = arith.mulf %363, %343 : vector<8x128xf32>
    %365 = arith.mulf %341, %341 : vector<8x128xf32>
    %366 = arith.mulf %364, %365 : vector<8x128xf32>
    %cst_127 = arith.constant 1.150000e+02 : f32
    %367 = vector.broadcast %cst_127 : f32 to vector<8x128xf32>
    %368 = arith.subf %333, %367 : vector<8x128xf32>
    %369 = arith.mulf %358, %368 : vector<8x128xf32>
    %cst_128 = arith.constant -1.200000e+01 : f32
    %370 = vector.broadcast %cst_128 : f32 to vector<8x128xf32>
    %371 = arith.subf %333, %370 : vector<8x128xf32>
    %372 = arith.mulf %362, %371 : vector<8x128xf32>
    %cst_129 = arith.constant 1.060000e+01 : f32
    %373 = vector.broadcast %cst_129 : f32 to vector<8x128xf32>
    %374 = arith.subf %333, %373 : vector<8x128xf32>
    %cst_130 = arith.constant 3.000000e-01 : f32
    %375 = vector.broadcast %cst_130 : f32 to vector<8x128xf32>
    %376 = arith.mulf %375, %374 : vector<8x128xf32>
    %cst_131 = arith.constant 1.200000e+02 : f32
    %377 = vector.broadcast %cst_131 : f32 to vector<8x128xf32>
    %378 = arith.subf %333, %377 : vector<8x128xf32>
    %379 = arith.mulf %366, %378 : vector<8x128xf32>
    %380 = arith.subf %353, %369 : vector<8x128xf32>
    %381 = arith.subf %380, %372 : vector<8x128xf32>
    %382 = arith.subf %381, %376 : vector<8x128xf32>
    %383 = arith.subf %382, %379 : vector<8x128xf32>
    %384 = arith.mulf %383, %8 : vector<8x128xf32>
    %385 = arith.addf %333, %384 : vector<8x128xf32>
    %386 = arith.mulf %335, %10 : vector<8x128xf32>
    %387 = arith.addf %386, %12 : vector<8x128xf32>
    %388 = arith.mulf %337, %14 : vector<8x128xf32>
    %389 = arith.addf %388, %16 : vector<8x128xf32>
    %390 = arith.mulf %339, %18 : vector<8x128xf32>
    %391 = arith.addf %390, %20 : vector<8x128xf32>
    %392 = arith.mulf %341, %22 : vector<8x128xf32>
    %393 = arith.addf %392, %24 : vector<8x128xf32>
    %394 = arith.mulf %343, %26 : vector<8x128xf32>
    %395 = arith.addf %394, %28 : vector<8x128xf32>
    %cst_132 = arith.constant 2.000000e+00 : f32
    %396 = vector.broadcast %cst_132 : f32 to vector<8x128xf32>
    %397 = arith.subf %385, %396 : vector<8x128xf32>
    %cst_133 = arith.constant 0.000000e+00 : f32
    %398 = vector.broadcast %cst_133 : f32 to vector<8x128xf32>
    %399 = arith.cmpf ogt, %397, %398 : vector<8x128xf32>
    %400 = arith.extui %399 : vector<8x128xi1> to vector<8x128xi32>
    %401 = arith.sitofp %400 : vector<8x128xi32> to vector<8x128xf32>
    %c6_134 = arith.constant 6 : index
    %c0_135 = arith.constant 0 : index
    %c0_136 = arith.constant 0 : index
    %402 = vector.load %arg5[%c6_134, %c0_135, %c0_136] : memref<16x8x128xf32, #tpu.memory_space<vmem>>, vector<1x8x128xf32>
    %403 = vector.shape_cast %402 : vector<1x8x128xf32> to vector<8x128xf32>
    %404 = vector.shape_cast %401 : vector<8x128xf32> to vector<1x8x128xf32>
    tpu.vector_store %arg5[%c6_134, %c0_135, %c0_136], %404 {strides = array<i32>} : memref<16x8x128xf32, #tpu.memory_space<vmem>>, vector<1x8x128xf32>,
    %405 = vector.extract_strided_slice %6 {offsets = [56, 0], sizes = [8, 128], strides = [1, 1]} : vector<128x128xf32> to vector<8x128xf32>
    %cst_137 = arith.constant 1.200000e+02 : f32
    %406 = vector.broadcast %cst_137 : f32 to vector<8x128xf32>
    %407 = arith.mulf %406, %391 : vector<8x128xf32>
    %408 = arith.mulf %389, %389 : vector<8x128xf32>
    %409 = arith.mulf %408, %389 : vector<8x128xf32>
    %410 = arith.mulf %407, %409 : vector<8x128xf32>
    %411 = arith.mulf %387, %387 : vector<8x128xf32>
    %412 = arith.mulf %411, %411 : vector<8x128xf32>
    %cst_138 = arith.constant 3.600000e+01 : f32
    %413 = vector.broadcast %cst_138 : f32 to vector<8x128xf32>
    %414 = arith.mulf %413, %412 : vector<8x128xf32>
    %cst_139 = arith.constant 1.000000e-01 : f32
    %415 = vector.broadcast %cst_139 : f32 to vector<8x128xf32>
    %416 = arith.mulf %415, %395 : vector<8x128xf32>
    %417 = arith.mulf %393, %393 : vector<8x128xf32>
    %418 = arith.mulf %416, %417 : vector<8x128xf32>
    %cst_140 = arith.constant 1.150000e+02 : f32
    %419 = vector.broadcast %cst_140 : f32 to vector<8x128xf32>
    %420 = arith.subf %385, %419 : vector<8x128xf32>
    %421 = arith.mulf %410, %420 : vector<8x128xf32>
    %cst_141 = arith.constant -1.200000e+01 : f32
    %422 = vector.broadcast %cst_141 : f32 to vector<8x128xf32>
    %423 = arith.subf %385, %422 : vector<8x128xf32>
    %424 = arith.mulf %414, %423 : vector<8x128xf32>
    %cst_142 = arith.constant 1.060000e+01 : f32
    %425 = vector.broadcast %cst_142 : f32 to vector<8x128xf32>
    %426 = arith.subf %385, %425 : vector<8x128xf32>
    %cst_143 = arith.constant 3.000000e-01 : f32
    %427 = vector.broadcast %cst_143 : f32 to vector<8x128xf32>
    %428 = arith.mulf %427, %426 : vector<8x128xf32>
    %cst_144 = arith.constant 1.200000e+02 : f32
    %429 = vector.broadcast %cst_144 : f32 to vector<8x128xf32>
    %430 = arith.subf %385, %429 : vector<8x128xf32>
    %431 = arith.mulf %418, %430 : vector<8x128xf32>
    %432 = arith.subf %405, %421 : vector<8x128xf32>
    %433 = arith.subf %432, %424 : vector<8x128xf32>
    %434 = arith.subf %433, %428 : vector<8x128xf32>
    %435 = arith.subf %434, %431 : vector<8x128xf32>
    %436 = arith.mulf %435, %8 : vector<8x128xf32>
    %437 = arith.addf %385, %436 : vector<8x128xf32>
    %438 = arith.mulf %387, %10 : vector<8x128xf32>
    %439 = arith.addf %438, %12 : vector<8x128xf32>
    %440 = arith.mulf %389, %14 : vector<8x128xf32>
    %441 = arith.addf %440, %16 : vector<8x128xf32>
    %442 = arith.mulf %391, %18 : vector<8x128xf32>
    %443 = arith.addf %442, %20 : vector<8x128xf32>
    %444 = arith.mulf %393, %22 : vector<8x128xf32>
    %445 = arith.addf %444, %24 : vector<8x128xf32>
    %446 = arith.mulf %395, %26 : vector<8x128xf32>
    %447 = arith.addf %446, %28 : vector<8x128xf32>
    %cst_145 = arith.constant 2.000000e+00 : f32
    %448 = vector.broadcast %cst_145 : f32 to vector<8x128xf32>
    %449 = arith.subf %437, %448 : vector<8x128xf32>
    %cst_146 = arith.constant 0.000000e+00 : f32
    %450 = vector.broadcast %cst_146 : f32 to vector<8x128xf32>
    %451 = arith.cmpf ogt, %449, %450 : vector<8x128xf32>
    %452 = arith.extui %451 : vector<8x128xi1> to vector<8x128xi32>
    %453 = arith.sitofp %452 : vector<8x128xi32> to vector<8x128xf32>
    %c7_147 = arith.constant 7 : index
    %c0_148 = arith.constant 0 : index
    %c0_149 = arith.constant 0 : index
    %454 = vector.load %arg5[%c7_147, %c0_148, %c0_149] : memref<16x8x128xf32, #tpu.memory_space<vmem>>, vector<1x8x128xf32>
    %455 = vector.shape_cast %454 : vector<1x8x128xf32> to vector<8x128xf32>
    %456 = vector.shape_cast %453 : vector<8x128xf32> to vector<1x8x128xf32>
    tpu.vector_store %arg5[%c7_147, %c0_148, %c0_149], %456 {strides = array<i32>} : memref<16x8x128xf32, #tpu.memory_space<vmem>>, vector<1x8x128xf32>,
    %457 = vector.extract_strided_slice %6 {offsets = [64, 0], sizes = [8, 128], strides = [1, 1]} : vector<128x128xf32> to vector<8x128xf32>
    %cst_150 = arith.constant 1.200000e+02 : f32
    %458 = vector.broadcast %cst_150 : f32 to vector<8x128xf32>
    %459 = arith.mulf %458, %443 : vector<8x128xf32>
    %460 = arith.mulf %441, %441 : vector<8x128xf32>
    %461 = arith.mulf %460, %441 : vector<8x128xf32>
    %462 = arith.mulf %459, %461 : vector<8x128xf32>
    %463 = arith.mulf %439, %439 : vector<8x128xf32>
    %464 = arith.mulf %463, %463 : vector<8x128xf32>
    %cst_151 = arith.constant 3.600000e+01 : f32
    %465 = vector.broadcast %cst_151 : f32 to vector<8x128xf32>
    %466 = arith.mulf %465, %464 : vector<8x128xf32>
    %cst_152 = arith.constant 1.000000e-01 : f32
    %467 = vector.broadcast %cst_152 : f32 to vector<8x128xf32>
    %468 = arith.mulf %467, %447 : vector<8x128xf32>
    %469 = arith.mulf %445, %445 : vector<8x128xf32>
    %470 = arith.mulf %468, %469 : vector<8x128xf32>
    %cst_153 = arith.constant 1.150000e+02 : f32
    %471 = vector.broadcast %cst_153 : f32 to vector<8x128xf32>
    %472 = arith.subf %437, %471 : vector<8x128xf32>
    %473 = arith.mulf %462, %472 : vector<8x128xf32>
    %cst_154 = arith.constant -1.200000e+01 : f32
    %474 = vector.broadcast %cst_154 : f32 to vector<8x128xf32>
    %475 = arith.subf %437, %474 : vector<8x128xf32>
    %476 = arith.mulf %466, %475 : vector<8x128xf32>
    %cst_155 = arith.constant 1.060000e+01 : f32
    %477 = vector.broadcast %cst_155 : f32 to vector<8x128xf32>
    %478 = arith.subf %437, %477 : vector<8x128xf32>
    %cst_156 = arith.constant 3.000000e-01 : f32
    %479 = vector.broadcast %cst_156 : f32 to vector<8x128xf32>
    %480 = arith.mulf %479, %478 : vector<8x128xf32>
    %cst_157 = arith.constant 1.200000e+02 : f32
    %481 = vector.broadcast %cst_157 : f32 to vector<8x128xf32>
    %482 = arith.subf %437, %481 : vector<8x128xf32>
    %483 = arith.mulf %470, %482 : vector<8x128xf32>
    %484 = arith.subf %457, %473 : vector<8x128xf32>
    %485 = arith.subf %484, %476 : vector<8x128xf32>
    %486 = arith.subf %485, %480 : vector<8x128xf32>
    %487 = arith.subf %486, %483 : vector<8x128xf32>
    %488 = arith.mulf %487, %8 : vector<8x128xf32>
    %489 = arith.addf %437, %488 : vector<8x128xf32>
    %490 = arith.mulf %439, %10 : vector<8x128xf32>
    %491 = arith.addf %490, %12 : vector<8x128xf32>
    %492 = arith.mulf %441, %14 : vector<8x128xf32>
    %493 = arith.addf %492, %16 : vector<8x128xf32>
    %494 = arith.mulf %443, %18 : vector<8x128xf32>
    %495 = arith.addf %494, %20 : vector<8x128xf32>
    %496 = arith.mulf %445, %22 : vector<8x128xf32>
    %497 = arith.addf %496, %24 : vector<8x128xf32>
    %498 = arith.mulf %447, %26 : vector<8x128xf32>
    %499 = arith.addf %498, %28 : vector<8x128xf32>
    %cst_158 = arith.constant 2.000000e+00 : f32
    %500 = vector.broadcast %cst_158 : f32 to vector<8x128xf32>
    %501 = arith.subf %489, %500 : vector<8x128xf32>
    %cst_159 = arith.constant 0.000000e+00 : f32
    %502 = vector.broadcast %cst_159 : f32 to vector<8x128xf32>
    %503 = arith.cmpf ogt, %501, %502 : vector<8x128xf32>
    %504 = arith.extui %503 : vector<8x128xi1> to vector<8x128xi32>
    %505 = arith.sitofp %504 : vector<8x128xi32> to vector<8x128xf32>
    %c8_160 = arith.constant 8 : index
    %c0_161 = arith.constant 0 : index
    %c0_162 = arith.constant 0 : index
    %506 = vector.load %arg5[%c8_160, %c0_161, %c0_162] : memref<16x8x128xf32, #tpu.memory_space<vmem>>, vector<1x8x128xf32>
    %507 = vector.shape_cast %506 : vector<1x8x128xf32> to vector<8x128xf32>
    %508 = vector.shape_cast %505 : vector<8x128xf32> to vector<1x8x128xf32>
    tpu.vector_store %arg5[%c8_160, %c0_161, %c0_162], %508 {strides = array<i32>} : memref<16x8x128xf32, #tpu.memory_space<vmem>>, vector<1x8x128xf32>,
    %509 = vector.extract_strided_slice %6 {offsets = [72, 0], sizes = [8, 128], strides = [1, 1]} : vector<128x128xf32> to vector<8x128xf32>
    %cst_163 = arith.constant 1.200000e+02 : f32
    %510 = vector.broadcast %cst_163 : f32 to vector<8x128xf32>
    %511 = arith.mulf %510, %495 : vector<8x128xf32>
    %512 = arith.mulf %493, %493 : vector<8x128xf32>
    %513 = arith.mulf %512, %493 : vector<8x128xf32>
    %514 = arith.mulf %511, %513 : vector<8x128xf32>
    %515 = arith.mulf %491, %491 : vector<8x128xf32>
    %516 = arith.mulf %515, %515 : vector<8x128xf32>
    %cst_164 = arith.constant 3.600000e+01 : f32
    %517 = vector.broadcast %cst_164 : f32 to vector<8x128xf32>
    %518 = arith.mulf %517, %516 : vector<8x128xf32>
    %cst_165 = arith.constant 1.000000e-01 : f32
    %519 = vector.broadcast %cst_165 : f32 to vector<8x128xf32>
    %520 = arith.mulf %519, %499 : vector<8x128xf32>
    %521 = arith.mulf %497, %497 : vector<8x128xf32>
    %522 = arith.mulf %520, %521 : vector<8x128xf32>
    %cst_166 = arith.constant 1.150000e+02 : f32
    %523 = vector.broadcast %cst_166 : f32 to vector<8x128xf32>
    %524 = arith.subf %489, %523 : vector<8x128xf32>
    %525 = arith.mulf %514, %524 : vector<8x128xf32>
    %cst_167 = arith.constant -1.200000e+01 : f32
    %526 = vector.broadcast %cst_167 : f32 to vector<8x128xf32>
    %527 = arith.subf %489, %526 : vector<8x128xf32>
    %528 = arith.mulf %518, %527 : vector<8x128xf32>
    %cst_168 = arith.constant 1.060000e+01 : f32
    %529 = vector.broadcast %cst_168 : f32 to vector<8x128xf32>
    %530 = arith.subf %489, %529 : vector<8x128xf32>
    %cst_169 = arith.constant 3.000000e-01 : f32
    %531 = vector.broadcast %cst_169 : f32 to vector<8x128xf32>
    %532 = arith.mulf %531, %530 : vector<8x128xf32>
    %cst_170 = arith.constant 1.200000e+02 : f32
    %533 = vector.broadcast %cst_170 : f32 to vector<8x128xf32>
    %534 = arith.subf %489, %533 : vector<8x128xf32>
    %535 = arith.mulf %522, %534 : vector<8x128xf32>
    %536 = arith.subf %509, %525 : vector<8x128xf32>
    %537 = arith.subf %536, %528 : vector<8x128xf32>
    %538 = arith.subf %537, %532 : vector<8x128xf32>
    %539 = arith.subf %538, %535 : vector<8x128xf32>
    %540 = arith.mulf %539, %8 : vector<8x128xf32>
    %541 = arith.addf %489, %540 : vector<8x128xf32>
    %542 = arith.mulf %491, %10 : vector<8x128xf32>
    %543 = arith.addf %542, %12 : vector<8x128xf32>
    %544 = arith.mulf %493, %14 : vector<8x128xf32>
    %545 = arith.addf %544, %16 : vector<8x128xf32>
    %546 = arith.mulf %495, %18 : vector<8x128xf32>
    %547 = arith.addf %546, %20 : vector<8x128xf32>
    %548 = arith.mulf %497, %22 : vector<8x128xf32>
    %549 = arith.addf %548, %24 : vector<8x128xf32>
    %550 = arith.mulf %499, %26 : vector<8x128xf32>
    %551 = arith.addf %550, %28 : vector<8x128xf32>
    %cst_171 = arith.constant 2.000000e+00 : f32
    %552 = vector.broadcast %cst_171 : f32 to vector<8x128xf32>
    %553 = arith.subf %541, %552 : vector<8x128xf32>
    %cst_172 = arith.constant 0.000000e+00 : f32
    %554 = vector.broadcast %cst_172 : f32 to vector<8x128xf32>
    %555 = arith.cmpf ogt, %553, %554 : vector<8x128xf32>
    %556 = arith.extui %555 : vector<8x128xi1> to vector<8x128xi32>
    %557 = arith.sitofp %556 : vector<8x128xi32> to vector<8x128xf32>
    %c9_173 = arith.constant 9 : index
    %c0_174 = arith.constant 0 : index
    %c0_175 = arith.constant 0 : index
    %558 = vector.load %arg5[%c9_173, %c0_174, %c0_175] : memref<16x8x128xf32, #tpu.memory_space<vmem>>, vector<1x8x128xf32>
    %559 = vector.shape_cast %558 : vector<1x8x128xf32> to vector<8x128xf32>
    %560 = vector.shape_cast %557 : vector<8x128xf32> to vector<1x8x128xf32>
    tpu.vector_store %arg5[%c9_173, %c0_174, %c0_175], %560 {strides = array<i32>} : memref<16x8x128xf32, #tpu.memory_space<vmem>>, vector<1x8x128xf32>,
    %561 = vector.extract_strided_slice %6 {offsets = [80, 0], sizes = [8, 128], strides = [1, 1]} : vector<128x128xf32> to vector<8x128xf32>
    %cst_176 = arith.constant 1.200000e+02 : f32
    %562 = vector.broadcast %cst_176 : f32 to vector<8x128xf32>
    %563 = arith.mulf %562, %547 : vector<8x128xf32>
    %564 = arith.mulf %545, %545 : vector<8x128xf32>
    %565 = arith.mulf %564, %545 : vector<8x128xf32>
    %566 = arith.mulf %563, %565 : vector<8x128xf32>
    %567 = arith.mulf %543, %543 : vector<8x128xf32>
    %568 = arith.mulf %567, %567 : vector<8x128xf32>
    %cst_177 = arith.constant 3.600000e+01 : f32
    %569 = vector.broadcast %cst_177 : f32 to vector<8x128xf32>
    %570 = arith.mulf %569, %568 : vector<8x128xf32>
    %cst_178 = arith.constant 1.000000e-01 : f32
    %571 = vector.broadcast %cst_178 : f32 to vector<8x128xf32>
    %572 = arith.mulf %571, %551 : vector<8x128xf32>
    %573 = arith.mulf %549, %549 : vector<8x128xf32>
    %574 = arith.mulf %572, %573 : vector<8x128xf32>
    %cst_179 = arith.constant 1.150000e+02 : f32
    %575 = vector.broadcast %cst_179 : f32 to vector<8x128xf32>
    %576 = arith.subf %541, %575 : vector<8x128xf32>
    %577 = arith.mulf %566, %576 : vector<8x128xf32>
    %cst_180 = arith.constant -1.200000e+01 : f32
    %578 = vector.broadcast %cst_180 : f32 to vector<8x128xf32>
    %579 = arith.subf %541, %578 : vector<8x128xf32>
    %580 = arith.mulf %570, %579 : vector<8x128xf32>
    %cst_181 = arith.constant 1.060000e+01 : f32
    %581 = vector.broadcast %cst_181 : f32 to vector<8x128xf32>
    %582 = arith.subf %541, %581 : vector<8x128xf32>
    %cst_182 = arith.constant 3.000000e-01 : f32
    %583 = vector.broadcast %cst_182 : f32 to vector<8x128xf32>
    %584 = arith.mulf %583, %582 : vector<8x128xf32>
    %cst_183 = arith.constant 1.200000e+02 : f32
    %585 = vector.broadcast %cst_183 : f32 to vector<8x128xf32>
    %586 = arith.subf %541, %585 : vector<8x128xf32>
    %587 = arith.mulf %574, %586 : vector<8x128xf32>
    %588 = arith.subf %561, %577 : vector<8x128xf32>
    %589 = arith.subf %588, %580 : vector<8x128xf32>
    %590 = arith.subf %589, %584 : vector<8x128xf32>
    %591 = arith.subf %590, %587 : vector<8x128xf32>
    %592 = arith.mulf %591, %8 : vector<8x128xf32>
    %593 = arith.addf %541, %592 : vector<8x128xf32>
    %594 = arith.mulf %543, %10 : vector<8x128xf32>
    %595 = arith.addf %594, %12 : vector<8x128xf32>
    %596 = arith.mulf %545, %14 : vector<8x128xf32>
    %597 = arith.addf %596, %16 : vector<8x128xf32>
    %598 = arith.mulf %547, %18 : vector<8x128xf32>
    %599 = arith.addf %598, %20 : vector<8x128xf32>
    %600 = arith.mulf %549, %22 : vector<8x128xf32>
    %601 = arith.addf %600, %24 : vector<8x128xf32>
    %602 = arith.mulf %551, %26 : vector<8x128xf32>
    %603 = arith.addf %602, %28 : vector<8x128xf32>
    %cst_184 = arith.constant 2.000000e+00 : f32
    %604 = vector.broadcast %cst_184 : f32 to vector<8x128xf32>
    %605 = arith.subf %593, %604 : vector<8x128xf32>
    %cst_185 = arith.constant 0.000000e+00 : f32
    %606 = vector.broadcast %cst_185 : f32 to vector<8x128xf32>
    %607 = arith.cmpf ogt, %605, %606 : vector<8x128xf32>
    %608 = arith.extui %607 : vector<8x128xi1> to vector<8x128xi32>
    %609 = arith.sitofp %608 : vector<8x128xi32> to vector<8x128xf32>
    %c10_186 = arith.constant 10 : index
    %c0_187 = arith.constant 0 : index
    %c0_188 = arith.constant 0 : index
    %610 = vector.load %arg5[%c10_186, %c0_187, %c0_188] : memref<16x8x128xf32, #tpu.memory_space<vmem>>, vector<1x8x128xf32>
    %611 = vector.shape_cast %610 : vector<1x8x128xf32> to vector<8x128xf32>
    %612 = vector.shape_cast %609 : vector<8x128xf32> to vector<1x8x128xf32>
    tpu.vector_store %arg5[%c10_186, %c0_187, %c0_188], %612 {strides = array<i32>} : memref<16x8x128xf32, #tpu.memory_space<vmem>>, vector<1x8x128xf32>,
    %613 = vector.extract_strided_slice %6 {offsets = [88, 0], sizes = [8, 128], strides = [1, 1]} : vector<128x128xf32> to vector<8x128xf32>
    %cst_189 = arith.constant 1.200000e+02 : f32
    %614 = vector.broadcast %cst_189 : f32 to vector<8x128xf32>
    %615 = arith.mulf %614, %599 : vector<8x128xf32>
    %616 = arith.mulf %597, %597 : vector<8x128xf32>
    %617 = arith.mulf %616, %597 : vector<8x128xf32>
    %618 = arith.mulf %615, %617 : vector<8x128xf32>
    %619 = arith.mulf %595, %595 : vector<8x128xf32>
    %620 = arith.mulf %619, %619 : vector<8x128xf32>
    %cst_190 = arith.constant 3.600000e+01 : f32
    %621 = vector.broadcast %cst_190 : f32 to vector<8x128xf32>
    %622 = arith.mulf %621, %620 : vector<8x128xf32>
    %cst_191 = arith.constant 1.000000e-01 : f32
    %623 = vector.broadcast %cst_191 : f32 to vector<8x128xf32>
    %624 = arith.mulf %623, %603 : vector<8x128xf32>
    %625 = arith.mulf %601, %601 : vector<8x128xf32>
    %626 = arith.mulf %624, %625 : vector<8x128xf32>
    %cst_192 = arith.constant 1.150000e+02 : f32
    %627 = vector.broadcast %cst_192 : f32 to vector<8x128xf32>
    %628 = arith.subf %593, %627 : vector<8x128xf32>
    %629 = arith.mulf %618, %628 : vector<8x128xf32>
    %cst_193 = arith.constant -1.200000e+01 : f32
    %630 = vector.broadcast %cst_193 : f32 to vector<8x128xf32>
    %631 = arith.subf %593, %630 : vector<8x128xf32>
    %632 = arith.mulf %622, %631 : vector<8x128xf32>
    %cst_194 = arith.constant 1.060000e+01 : f32
    %633 = vector.broadcast %cst_194 : f32 to vector<8x128xf32>
    %634 = arith.subf %593, %633 : vector<8x128xf32>
    %cst_195 = arith.constant 3.000000e-01 : f32
    %635 = vector.broadcast %cst_195 : f32 to vector<8x128xf32>
    %636 = arith.mulf %635, %634 : vector<8x128xf32>
    %cst_196 = arith.constant 1.200000e+02 : f32
    %637 = vector.broadcast %cst_196 : f32 to vector<8x128xf32>
    %638 = arith.subf %593, %637 : vector<8x128xf32>
    %639 = arith.mulf %626, %638 : vector<8x128xf32>
    %640 = arith.subf %613, %629 : vector<8x128xf32>
    %641 = arith.subf %640, %632 : vector<8x128xf32>
    %642 = arith.subf %641, %636 : vector<8x128xf32>
    %643 = arith.subf %642, %639 : vector<8x128xf32>
    %644 = arith.mulf %643, %8 : vector<8x128xf32>
    %645 = arith.addf %593, %644 : vector<8x128xf32>
    %646 = arith.mulf %595, %10 : vector<8x128xf32>
    %647 = arith.addf %646, %12 : vector<8x128xf32>
    %648 = arith.mulf %597, %14 : vector<8x128xf32>
    %649 = arith.addf %648, %16 : vector<8x128xf32>
    %650 = arith.mulf %599, %18 : vector<8x128xf32>
    %651 = arith.addf %650, %20 : vector<8x128xf32>
    %652 = arith.mulf %601, %22 : vector<8x128xf32>
    %653 = arith.addf %652, %24 : vector<8x128xf32>
    %654 = arith.mulf %603, %26 : vector<8x128xf32>
    %655 = arith.addf %654, %28 : vector<8x128xf32>
    %cst_197 = arith.constant 2.000000e+00 : f32
    %656 = vector.broadcast %cst_197 : f32 to vector<8x128xf32>
    %657 = arith.subf %645, %656 : vector<8x128xf32>
    %cst_198 = arith.constant 0.000000e+00 : f32
    %658 = vector.broadcast %cst_198 : f32 to vector<8x128xf32>
    %659 = arith.cmpf ogt, %657, %658 : vector<8x128xf32>
    %660 = arith.extui %659 : vector<8x128xi1> to vector<8x128xi32>
    %661 = arith.sitofp %660 : vector<8x128xi32> to vector<8x128xf32>
    %c11 = arith.constant 11 : index
    %c0_199 = arith.constant 0 : index
    %c0_200 = arith.constant 0 : index
    %662 = vector.load %arg5[%c11, %c0_199, %c0_200] : memref<16x8x128xf32, #tpu.memory_space<vmem>>, vector<1x8x128xf32>
    %663 = vector.shape_cast %662 : vector<1x8x128xf32> to vector<8x128xf32>
    %664 = vector.shape_cast %661 : vector<8x128xf32> to vector<1x8x128xf32>
    tpu.vector_store %arg5[%c11, %c0_199, %c0_200], %664 {strides = array<i32>} : memref<16x8x128xf32, #tpu.memory_space<vmem>>, vector<1x8x128xf32>,
    %665 = vector.extract_strided_slice %6 {offsets = [96, 0], sizes = [8, 128], strides = [1, 1]} : vector<128x128xf32> to vector<8x128xf32>
    %cst_201 = arith.constant 1.200000e+02 : f32
    %666 = vector.broadcast %cst_201 : f32 to vector<8x128xf32>
    %667 = arith.mulf %666, %651 : vector<8x128xf32>
    %668 = arith.mulf %649, %649 : vector<8x128xf32>
    %669 = arith.mulf %668, %649 : vector<8x128xf32>
    %670 = arith.mulf %667, %669 : vector<8x128xf32>
    %671 = arith.mulf %647, %647 : vector<8x128xf32>
    %672 = arith.mulf %671, %671 : vector<8x128xf32>
    %cst_202 = arith.constant 3.600000e+01 : f32
    %673 = vector.broadcast %cst_202 : f32 to vector<8x128xf32>
    %674 = arith.mulf %673, %672 : vector<8x128xf32>
    %cst_203 = arith.constant 1.000000e-01 : f32
    %675 = vector.broadcast %cst_203 : f32 to vector<8x128xf32>
    %676 = arith.mulf %675, %655 : vector<8x128xf32>
    %677 = arith.mulf %653, %653 : vector<8x128xf32>
    %678 = arith.mulf %676, %677 : vector<8x128xf32>
    %cst_204 = arith.constant 1.150000e+02 : f32
    %679 = vector.broadcast %cst_204 : f32 to vector<8x128xf32>
    %680 = arith.subf %645, %679 : vector<8x128xf32>
    %681 = arith.mulf %670, %680 : vector<8x128xf32>
    %cst_205 = arith.constant -1.200000e+01 : f32
    %682 = vector.broadcast %cst_205 : f32 to vector<8x128xf32>
    %683 = arith.subf %645, %682 : vector<8x128xf32>
    %684 = arith.mulf %674, %683 : vector<8x128xf32>
    %cst_206 = arith.constant 1.060000e+01 : f32
    %685 = vector.broadcast %cst_206 : f32 to vector<8x128xf32>
    %686 = arith.subf %645, %685 : vector<8x128xf32>
    %cst_207 = arith.constant 3.000000e-01 : f32
    %687 = vector.broadcast %cst_207 : f32 to vector<8x128xf32>
    %688 = arith.mulf %687, %686 : vector<8x128xf32>
    %cst_208 = arith.constant 1.200000e+02 : f32
    %689 = vector.broadcast %cst_208 : f32 to vector<8x128xf32>
    %690 = arith.subf %645, %689 : vector<8x128xf32>
    %691 = arith.mulf %678, %690 : vector<8x128xf32>
    %692 = arith.subf %665, %681 : vector<8x128xf32>
    %693 = arith.subf %692, %684 : vector<8x128xf32>
    %694 = arith.subf %693, %688 : vector<8x128xf32>
    %695 = arith.subf %694, %691 : vector<8x128xf32>
    %696 = arith.mulf %695, %8 : vector<8x128xf32>
    %697 = arith.addf %645, %696 : vector<8x128xf32>
    %698 = arith.mulf %647, %10 : vector<8x128xf32>
    %699 = arith.addf %698, %12 : vector<8x128xf32>
    %700 = arith.mulf %649, %14 : vector<8x128xf32>
    %701 = arith.addf %700, %16 : vector<8x128xf32>
    %702 = arith.mulf %651, %18 : vector<8x128xf32>
    %703 = arith.addf %702, %20 : vector<8x128xf32>
    %704 = arith.mulf %653, %22 : vector<8x128xf32>
    %705 = arith.addf %704, %24 : vector<8x128xf32>
    %706 = arith.mulf %655, %26 : vector<8x128xf32>
    %707 = arith.addf %706, %28 : vector<8x128xf32>
    %cst_209 = arith.constant 2.000000e+00 : f32
    %708 = vector.broadcast %cst_209 : f32 to vector<8x128xf32>
    %709 = arith.subf %697, %708 : vector<8x128xf32>
    %cst_210 = arith.constant 0.000000e+00 : f32
    %710 = vector.broadcast %cst_210 : f32 to vector<8x128xf32>
    %711 = arith.cmpf ogt, %709, %710 : vector<8x128xf32>
    %712 = arith.extui %711 : vector<8x128xi1> to vector<8x128xi32>
    %713 = arith.sitofp %712 : vector<8x128xi32> to vector<8x128xf32>
    %c12 = arith.constant 12 : index
    %c0_211 = arith.constant 0 : index
    %c0_212 = arith.constant 0 : index
    %714 = vector.load %arg5[%c12, %c0_211, %c0_212] : memref<16x8x128xf32, #tpu.memory_space<vmem>>, vector<1x8x128xf32>
    %715 = vector.shape_cast %714 : vector<1x8x128xf32> to vector<8x128xf32>
    %716 = vector.shape_cast %713 : vector<8x128xf32> to vector<1x8x128xf32>
    tpu.vector_store %arg5[%c12, %c0_211, %c0_212], %716 {strides = array<i32>} : memref<16x8x128xf32, #tpu.memory_space<vmem>>, vector<1x8x128xf32>,
    %717 = vector.extract_strided_slice %6 {offsets = [104, 0], sizes = [8, 128], strides = [1, 1]} : vector<128x128xf32> to vector<8x128xf32>
    %cst_213 = arith.constant 1.200000e+02 : f32
    %718 = vector.broadcast %cst_213 : f32 to vector<8x128xf32>
    %719 = arith.mulf %718, %703 : vector<8x128xf32>
    %720 = arith.mulf %701, %701 : vector<8x128xf32>
    %721 = arith.mulf %720, %701 : vector<8x128xf32>
    %722 = arith.mulf %719, %721 : vector<8x128xf32>
    %723 = arith.mulf %699, %699 : vector<8x128xf32>
    %724 = arith.mulf %723, %723 : vector<8x128xf32>
    %cst_214 = arith.constant 3.600000e+01 : f32
    %725 = vector.broadcast %cst_214 : f32 to vector<8x128xf32>
    %726 = arith.mulf %725, %724 : vector<8x128xf32>
    %cst_215 = arith.constant 1.000000e-01 : f32
    %727 = vector.broadcast %cst_215 : f32 to vector<8x128xf32>
    %728 = arith.mulf %727, %707 : vector<8x128xf32>
    %729 = arith.mulf %705, %705 : vector<8x128xf32>
    %730 = arith.mulf %728, %729 : vector<8x128xf32>
    %cst_216 = arith.constant 1.150000e+02 : f32
    %731 = vector.broadcast %cst_216 : f32 to vector<8x128xf32>
    %732 = arith.subf %697, %731 : vector<8x128xf32>
    %733 = arith.mulf %722, %732 : vector<8x128xf32>
    %cst_217 = arith.constant -1.200000e+01 : f32
    %734 = vector.broadcast %cst_217 : f32 to vector<8x128xf32>
    %735 = arith.subf %697, %734 : vector<8x128xf32>
    %736 = arith.mulf %726, %735 : vector<8x128xf32>
    %cst_218 = arith.constant 1.060000e+01 : f32
    %737 = vector.broadcast %cst_218 : f32 to vector<8x128xf32>
    %738 = arith.subf %697, %737 : vector<8x128xf32>
    %cst_219 = arith.constant 3.000000e-01 : f32
    %739 = vector.broadcast %cst_219 : f32 to vector<8x128xf32>
    %740 = arith.mulf %739, %738 : vector<8x128xf32>
    %cst_220 = arith.constant 1.200000e+02 : f32
    %741 = vector.broadcast %cst_220 : f32 to vector<8x128xf32>
    %742 = arith.subf %697, %741 : vector<8x128xf32>
    %743 = arith.mulf %730, %742 : vector<8x128xf32>
    %744 = arith.subf %717, %733 : vector<8x128xf32>
    %745 = arith.subf %744, %736 : vector<8x128xf32>
    %746 = arith.subf %745, %740 : vector<8x128xf32>
    %747 = arith.subf %746, %743 : vector<8x128xf32>
    %748 = arith.mulf %747, %8 : vector<8x128xf32>
    %749 = arith.addf %697, %748 : vector<8x128xf32>
    %750 = arith.mulf %699, %10 : vector<8x128xf32>
    %751 = arith.addf %750, %12 : vector<8x128xf32>
    %752 = arith.mulf %701, %14 : vector<8x128xf32>
    %753 = arith.addf %752, %16 : vector<8x128xf32>
    %754 = arith.mulf %703, %18 : vector<8x128xf32>
    %755 = arith.addf %754, %20 : vector<8x128xf32>
    %756 = arith.mulf %705, %22 : vector<8x128xf32>
    %757 = arith.addf %756, %24 : vector<8x128xf32>
    %758 = arith.mulf %707, %26 : vector<8x128xf32>
    %759 = arith.addf %758, %28 : vector<8x128xf32>
    %cst_221 = arith.constant 2.000000e+00 : f32
    %760 = vector.broadcast %cst_221 : f32 to vector<8x128xf32>
    %761 = arith.subf %749, %760 : vector<8x128xf32>
    %cst_222 = arith.constant 0.000000e+00 : f32
    %762 = vector.broadcast %cst_222 : f32 to vector<8x128xf32>
    %763 = arith.cmpf ogt, %761, %762 : vector<8x128xf32>
    %764 = arith.extui %763 : vector<8x128xi1> to vector<8x128xi32>
    %765 = arith.sitofp %764 : vector<8x128xi32> to vector<8x128xf32>
    %c13 = arith.constant 13 : index
    %c0_223 = arith.constant 0 : index
    %c0_224 = arith.constant 0 : index
    %766 = vector.load %arg5[%c13, %c0_223, %c0_224] : memref<16x8x128xf32, #tpu.memory_space<vmem>>, vector<1x8x128xf32>
    %767 = vector.shape_cast %766 : vector<1x8x128xf32> to vector<8x128xf32>
    %768 = vector.shape_cast %765 : vector<8x128xf32> to vector<1x8x128xf32>
    tpu.vector_store %arg5[%c13, %c0_223, %c0_224], %768 {strides = array<i32>} : memref<16x8x128xf32, #tpu.memory_space<vmem>>, vector<1x8x128xf32>,
    %769 = vector.extract_strided_slice %6 {offsets = [112, 0], sizes = [8, 128], strides = [1, 1]} : vector<128x128xf32> to vector<8x128xf32>
    %cst_225 = arith.constant 1.200000e+02 : f32
    %770 = vector.broadcast %cst_225 : f32 to vector<8x128xf32>
    %771 = arith.mulf %770, %755 : vector<8x128xf32>
    %772 = arith.mulf %753, %753 : vector<8x128xf32>
    %773 = arith.mulf %772, %753 : vector<8x128xf32>
    %774 = arith.mulf %771, %773 : vector<8x128xf32>
    %775 = arith.mulf %751, %751 : vector<8x128xf32>
    %776 = arith.mulf %775, %775 : vector<8x128xf32>
    %cst_226 = arith.constant 3.600000e+01 : f32
    %777 = vector.broadcast %cst_226 : f32 to vector<8x128xf32>
    %778 = arith.mulf %777, %776 : vector<8x128xf32>
    %cst_227 = arith.constant 1.000000e-01 : f32
    %779 = vector.broadcast %cst_227 : f32 to vector<8x128xf32>
    %780 = arith.mulf %779, %759 : vector<8x128xf32>
    %781 = arith.mulf %757, %757 : vector<8x128xf32>
    %782 = arith.mulf %780, %781 : vector<8x128xf32>
    %cst_228 = arith.constant 1.150000e+02 : f32
    %783 = vector.broadcast %cst_228 : f32 to vector<8x128xf32>
    %784 = arith.subf %749, %783 : vector<8x128xf32>
    %785 = arith.mulf %774, %784 : vector<8x128xf32>
    %cst_229 = arith.constant -1.200000e+01 : f32
    %786 = vector.broadcast %cst_229 : f32 to vector<8x128xf32>
    %787 = arith.subf %749, %786 : vector<8x128xf32>
    %788 = arith.mulf %778, %787 : vector<8x128xf32>
    %cst_230 = arith.constant 1.060000e+01 : f32
    %789 = vector.broadcast %cst_230 : f32 to vector<8x128xf32>
    %790 = arith.subf %749, %789 : vector<8x128xf32>
    %cst_231 = arith.constant 3.000000e-01 : f32
    %791 = vector.broadcast %cst_231 : f32 to vector<8x128xf32>
    %792 = arith.mulf %791, %790 : vector<8x128xf32>
    %cst_232 = arith.constant 1.200000e+02 : f32
    %793 = vector.broadcast %cst_232 : f32 to vector<8x128xf32>
    %794 = arith.subf %749, %793 : vector<8x128xf32>
    %795 = arith.mulf %782, %794 : vector<8x128xf32>
    %796 = arith.subf %769, %785 : vector<8x128xf32>
    %797 = arith.subf %796, %788 : vector<8x128xf32>
    %798 = arith.subf %797, %792 : vector<8x128xf32>
    %799 = arith.subf %798, %795 : vector<8x128xf32>
    %800 = arith.mulf %799, %8 : vector<8x128xf32>
    %801 = arith.addf %749, %800 : vector<8x128xf32>
    %802 = arith.mulf %751, %10 : vector<8x128xf32>
    %803 = arith.addf %802, %12 : vector<8x128xf32>
    %804 = arith.mulf %753, %14 : vector<8x128xf32>
    %805 = arith.addf %804, %16 : vector<8x128xf32>
    %806 = arith.mulf %755, %18 : vector<8x128xf32>
    %807 = arith.addf %806, %20 : vector<8x128xf32>
    %808 = arith.mulf %757, %22 : vector<8x128xf32>
    %809 = arith.addf %808, %24 : vector<8x128xf32>
    %810 = arith.mulf %759, %26 : vector<8x128xf32>
    %811 = arith.addf %810, %28 : vector<8x128xf32>
    %cst_233 = arith.constant 2.000000e+00 : f32
    %812 = vector.broadcast %cst_233 : f32 to vector<8x128xf32>
    %813 = arith.subf %801, %812 : vector<8x128xf32>
    %cst_234 = arith.constant 0.000000e+00 : f32
    %814 = vector.broadcast %cst_234 : f32 to vector<8x128xf32>
    %815 = arith.cmpf ogt, %813, %814 : vector<8x128xf32>
    %816 = arith.extui %815 : vector<8x128xi1> to vector<8x128xi32>
    %817 = arith.sitofp %816 : vector<8x128xi32> to vector<8x128xf32>
    %c14 = arith.constant 14 : index
    %c0_235 = arith.constant 0 : index
    %c0_236 = arith.constant 0 : index
    %818 = vector.load %arg5[%c14, %c0_235, %c0_236] : memref<16x8x128xf32, #tpu.memory_space<vmem>>, vector<1x8x128xf32>
    %819 = vector.shape_cast %818 : vector<1x8x128xf32> to vector<8x128xf32>
    %820 = vector.shape_cast %817 : vector<8x128xf32> to vector<1x8x128xf32>
    tpu.vector_store %arg5[%c14, %c0_235, %c0_236], %820 {strides = array<i32>} : memref<16x8x128xf32, #tpu.memory_space<vmem>>, vector<1x8x128xf32>,
    %821 = vector.extract_strided_slice %6 {offsets = [120, 0], sizes = [8, 128], strides = [1, 1]} : vector<128x128xf32> to vector<8x128xf32>
    %cst_237 = arith.constant 1.200000e+02 : f32
    %822 = vector.broadcast %cst_237 : f32 to vector<8x128xf32>
    %823 = arith.mulf %822, %807 : vector<8x128xf32>
    %824 = arith.mulf %805, %805 : vector<8x128xf32>
    %825 = arith.mulf %824, %805 : vector<8x128xf32>
    %826 = arith.mulf %823, %825 : vector<8x128xf32>
    %827 = arith.mulf %803, %803 : vector<8x128xf32>
    %828 = arith.mulf %827, %827 : vector<8x128xf32>
    %cst_238 = arith.constant 3.600000e+01 : f32
    %829 = vector.broadcast %cst_238 : f32 to vector<8x128xf32>
    %830 = arith.mulf %829, %828 : vector<8x128xf32>
    %cst_239 = arith.constant 1.000000e-01 : f32
    %831 = vector.broadcast %cst_239 : f32 to vector<8x128xf32>
    %832 = arith.mulf %831, %811 : vector<8x128xf32>
    %833 = arith.mulf %809, %809 : vector<8x128xf32>
    %834 = arith.mulf %832, %833 : vector<8x128xf32>
    %cst_240 = arith.constant 1.150000e+02 : f32
    %835 = vector.broadcast %cst_240 : f32 to vector<8x128xf32>
    %836 = arith.subf %801, %835 : vector<8x128xf32>
    %837 = arith.mulf %826, %836 : vector<8x128xf32>
    %cst_241 = arith.constant -1.200000e+01 : f32
    %838 = vector.broadcast %cst_241 : f32 to vector<8x128xf32>
    %839 = arith.subf %801, %838 : vector<8x128xf32>
    %840 = arith.mulf %830, %839 : vector<8x128xf32>
    %cst_242 = arith.constant 1.060000e+01 : f32
    %841 = vector.broadcast %cst_242 : f32 to vector<8x128xf32>
    %842 = arith.subf %801, %841 : vector<8x128xf32>
    %cst_243 = arith.constant 3.000000e-01 : f32
    %843 = vector.broadcast %cst_243 : f32 to vector<8x128xf32>
    %844 = arith.mulf %843, %842 : vector<8x128xf32>
    %cst_244 = arith.constant 1.200000e+02 : f32
    %845 = vector.broadcast %cst_244 : f32 to vector<8x128xf32>
    %846 = arith.subf %801, %845 : vector<8x128xf32>
    %847 = arith.mulf %834, %846 : vector<8x128xf32>
    %848 = arith.subf %821, %837 : vector<8x128xf32>
    %849 = arith.subf %848, %840 : vector<8x128xf32>
    %850 = arith.subf %849, %844 : vector<8x128xf32>
    %851 = arith.subf %850, %847 : vector<8x128xf32>
    %852 = arith.mulf %851, %8 : vector<8x128xf32>
    %853 = arith.addf %801, %852 : vector<8x128xf32>
    %854 = arith.mulf %803, %10 : vector<8x128xf32>
    %855 = arith.addf %854, %12 : vector<8x128xf32>
    %856 = arith.mulf %805, %14 : vector<8x128xf32>
    %857 = arith.addf %856, %16 : vector<8x128xf32>
    %858 = arith.mulf %807, %18 : vector<8x128xf32>
    %859 = arith.addf %858, %20 : vector<8x128xf32>
    %860 = arith.mulf %809, %22 : vector<8x128xf32>
    %861 = arith.addf %860, %24 : vector<8x128xf32>
    %862 = arith.mulf %811, %26 : vector<8x128xf32>
    %863 = arith.addf %862, %28 : vector<8x128xf32>
    %cst_245 = arith.constant 2.000000e+00 : f32
    %864 = vector.broadcast %cst_245 : f32 to vector<8x128xf32>
    %865 = arith.subf %853, %864 : vector<8x128xf32>
    %cst_246 = arith.constant 0.000000e+00 : f32
    %866 = vector.broadcast %cst_246 : f32 to vector<8x128xf32>
    %867 = arith.cmpf ogt, %865, %866 : vector<8x128xf32>
    %868 = arith.extui %867 : vector<8x128xi1> to vector<8x128xi32>
    %869 = arith.sitofp %868 : vector<8x128xi32> to vector<8x128xf32>
    %c15 = arith.constant 15 : index
    %c0_247 = arith.constant 0 : index
    %c0_248 = arith.constant 0 : index
    %870 = vector.load %arg5[%c15, %c0_247, %c0_248] : memref<16x8x128xf32, #tpu.memory_space<vmem>>, vector<1x8x128xf32>
    %871 = vector.shape_cast %870 : vector<1x8x128xf32> to vector<8x128xf32>
    %872 = vector.shape_cast %869 : vector<8x128xf32> to vector<1x8x128xf32>
    tpu.vector_store %arg5[%c15, %c0_247, %c0_248], %872 {strides = array<i32>} : memref<16x8x128xf32, #tpu.memory_space<vmem>>, vector<1x8x128xf32>,
    %c0_249 = arith.constant 0 : index
    %c0_250 = arith.constant 0 : index
    %c0_251 = arith.constant 0 : index
    %873 = vector.load %arg6[%c0_249, %c0_250, %c0_251] : memref<6x8x128xf32, #tpu.memory_space<vmem>>, vector<1x8x128xf32>
    %874 = vector.shape_cast %873 : vector<1x8x128xf32> to vector<8x128xf32>
    %875 = vector.shape_cast %853 : vector<8x128xf32> to vector<1x8x128xf32>
    tpu.vector_store %arg6[%c0_249, %c0_250, %c0_251], %875 {strides = array<i32>} : memref<6x8x128xf32, #tpu.memory_space<vmem>>, vector<1x8x128xf32>,
    %c1_252 = arith.constant 1 : index
    %c0_253 = arith.constant 0 : index
    %c0_254 = arith.constant 0 : index
    %876 = vector.load %arg6[%c1_252, %c0_253, %c0_254] : memref<6x8x128xf32, #tpu.memory_space<vmem>>, vector<1x8x128xf32>
    %877 = vector.shape_cast %876 : vector<1x8x128xf32> to vector<8x128xf32>
    %878 = vector.shape_cast %855 : vector<8x128xf32> to vector<1x8x128xf32>
    tpu.vector_store %arg6[%c1_252, %c0_253, %c0_254], %878 {strides = array<i32>} : memref<6x8x128xf32, #tpu.memory_space<vmem>>, vector<1x8x128xf32>,
    %c2_255 = arith.constant 2 : index
    %c0_256 = arith.constant 0 : index
    %c0_257 = arith.constant 0 : index
    %879 = vector.load %arg6[%c2_255, %c0_256, %c0_257] : memref<6x8x128xf32, #tpu.memory_space<vmem>>, vector<1x8x128xf32>
    %880 = vector.shape_cast %879 : vector<1x8x128xf32> to vector<8x128xf32>
    %881 = vector.shape_cast %857 : vector<8x128xf32> to vector<1x8x128xf32>
    tpu.vector_store %arg6[%c2_255, %c0_256, %c0_257], %881 {strides = array<i32>} : memref<6x8x128xf32, #tpu.memory_space<vmem>>, vector<1x8x128xf32>,
    %c3_258 = arith.constant 3 : index
    %c0_259 = arith.constant 0 : index
    %c0_260 = arith.constant 0 : index
    %882 = vector.load %arg6[%c3_258, %c0_259, %c0_260] : memref<6x8x128xf32, #tpu.memory_space<vmem>>, vector<1x8x128xf32>
    %883 = vector.shape_cast %882 : vector<1x8x128xf32> to vector<8x128xf32>
    %884 = vector.shape_cast %859 : vector<8x128xf32> to vector<1x8x128xf32>
    tpu.vector_store %arg6[%c3_258, %c0_259, %c0_260], %884 {strides = array<i32>} : memref<6x8x128xf32, #tpu.memory_space<vmem>>, vector<1x8x128xf32>,
    %c4_261 = arith.constant 4 : index
    %c0_262 = arith.constant 0 : index
    %c0_263 = arith.constant 0 : index
    %885 = vector.load %arg6[%c4_261, %c0_262, %c0_263] : memref<6x8x128xf32, #tpu.memory_space<vmem>>, vector<1x8x128xf32>
    %886 = vector.shape_cast %885 : vector<1x8x128xf32> to vector<8x128xf32>
    %887 = vector.shape_cast %861 : vector<8x128xf32> to vector<1x8x128xf32>
    tpu.vector_store %arg6[%c4_261, %c0_262, %c0_263], %887 {strides = array<i32>} : memref<6x8x128xf32, #tpu.memory_space<vmem>>, vector<1x8x128xf32>,
    %c5_264 = arith.constant 5 : index
    %c0_265 = arith.constant 0 : index
    %c0_266 = arith.constant 0 : index
    %888 = vector.load %arg6[%c5_264, %c0_265, %c0_266] : memref<6x8x128xf32, #tpu.memory_space<vmem>>, vector<1x8x128xf32>
    %889 = vector.shape_cast %888 : vector<1x8x128xf32> to vector<8x128xf32>
    %890 = vector.shape_cast %863 : vector<8x128xf32> to vector<1x8x128xf32>
    tpu.vector_store %arg6[%c5_264, %c0_265, %c0_266], %890 {strides = array<i32>} : memref<6x8x128xf32, #tpu.memory_space<vmem>>, vector<1x8x128xf32>,
    return
  }
  func.func @transform_0(%arg0: i32, %arg1: i32) -> (i32, i32, i32) {
    %c0_i32 = arith.constant 0 : i32
    %c0_i32_0 = arith.constant 0 : i32
    return %arg1, %arg0, %c0_i32 : i32, i32, i32
  }
  func.func @transform_1(%arg0: i32, %arg1: i32) -> (i32, i32) {
    %c0_i32 = arith.constant 0 : i32
    %c0_i32_0 = arith.constant 0 : i32
    %c0_i32_1 = arith.constant 0 : i32
    return %c0_i32, %c0_i32_0 : i32, i32
  }
  func.func @transform_2(%arg0: i32, %arg1: i32) -> (i32, i32, i32) {
    %c0_i32 = arith.constant 0 : i32
    %c0_i32_0 = arith.constant 0 : i32
    %c0_i32_1 = arith.constant 0 : i32
    %c0_i32_2 = arith.constant 0 : i32
    return %c0_i32, %c0_i32_0, %c0_i32_1 : i32, i32, i32
  }
  func.func @transform_3(%arg0: i32, %arg1: i32) -> (i32, i32, i32) {
    %c0_i32 = arith.constant 0 : i32
    %c0_i32_0 = arith.constant 0 : i32
    return %arg1, %arg0, %c0_i32 : i32, i32, i32
  }
}

</mosaic_0001>

<bundles_post_ra>
// kernel: hh_neuron_forward.1
= control target key start
LH: loop header
LB: loop body
LE: loop exit
PB: predicated region body
PF: predicated region fallthrough
CT: control target
= control target key end

     0   :  { %s1402_s1 = inlined_call_operand.vmem [shape: f32[128,128], index: 1, kind: input, shape index: {}]   ;;  %s1403_s0 = inlined_call_operand.vmem [shape: f32[16,8,128], index: 0, kind: input, shape index: {}]   ;;  %s1404_s2 = inlined_call_operand.vmem [shape: f32[11,8,128], index: 2, kind: input, shape index: {}]   ;;  %s1405_s3 = inlined_call_operand.vmem [shape: f32[16,8,128], index: 3, kind: output, shape index: {}]  }
   0x1   :  { %v55_v0 = vld [vmem:[%s1402_s1 + $0x78] sm:$0xff]  ;;  %v54_v1 = vld [vmem:[%s1402_s1 + $0x70] sm:$0xff]  ;;  %v53_v2 = vld [vmem:[%s1402_s1 + $0x68] sm:$0xff] }
   0x2   :  { %56 = vmatpush.msra.mxu0 %v55_v0  ;;  %924 = vmatpush.msra.mxu1 %v55_v0  ;;  %v52_v3 = vld [vmem:[%s1402_s1 + $0x60] sm:$0xff]  ;;  %v51_v4 = vld [vmem:[%s1402_s1 + $0x58] sm:$0xff]  ;;  %v50_v5 = vld [vmem:[%s1402_s1 + $0x50] sm:$0xff] }
   0x3   :  { %925 = vmatpush.msra.mxu2 %v55_v0  ;;  %926 = vmatpush.msra.mxu3 %v55_v0  ;;  %v49_v6 = vld [vmem:[%s1402_s1 + $0x48] sm:$0xff]  ;;  %v48_v7 = vld [vmem:[%s1402_s1 + $0x40] sm:$0xff]  ;;  %v47_v8 = vld [vmem:[%s1402_s1 + $0x38] sm:$0xff] }
   0x4   :  { %57 = vmatpush.msra.mxu0 %v54_v1  ;;  %927 = vmatpush.msra.mxu1 %v54_v1  ;;  %v46_v9 = vld [vmem:[%s1402_s1 + $0x30] sm:$0xff]  ;;  %v45_v10 = vld [vmem:[%s1402_s1 + $0x28] sm:$0xff]  ;;  %v44_v11 = vld [vmem:[%s1402_s1 + $0x20] sm:$0xff] }
   0x5   :  { %928 = vmatpush.msra.mxu2 %v54_v1  ;;  %929 = vmatpush.msra.mxu3 %v54_v1  ;;  %v43_v12 = vld [vmem:[%s1402_s1 + $0x18] sm:$0xff]  ;;  %v42_v13 = vld [vmem:[%s1402_s1 + $0x10] sm:$0xff]  ;;  %v41_v14 = vld [vmem:[%s1402_s1 + $0x8] sm:$0xff] }
   0x6   :  { %58 = vmatpush.msra.mxu0 %v53_v2  ;;  %930 = vmatpush.msra.mxu1 %v53_v2  ;;  %v40_v15 = vld [vmem:[%s1402_s1] sm:$0xff]  ;;  %v25_v19 = vld [vmem:[%s1403_s0 + $0x8] sm:$0xff]  ;;  %v26_v21 = vld [vmem:[%s1403_s0 + $0x10] sm:$0xff] }
   0x7   :  { %931 = vmatpush.msra.mxu2 %v53_v2  ;;  %932 = vmatpush.msra.mxu3 %v53_v2  ;;  %v24_v16 = vld [vmem:[%s1403_s0] sm:$0xff]  ;;  %v29_v20 = vld [vmem:[%s1403_s0 + $0x28] sm:$0xff]  ;;  %v30_v22 = vld [vmem:[%s1403_s0 + $0x30] sm:$0xff] }
   0x8   :  { %59 = vmatpush.msra.mxu0 %v52_v3  ;;  %933 = vmatpush.msra.mxu1 %v52_v3  ;;  %v28_v17 = vld [vmem:[%s1403_s0 + $0x20] sm:$0xff]  ;;  %v27_v23 = vld [vmem:[%s1403_s0 + $0x18] sm:$0xff]  ;;  %v33_v25 = vld [vmem:[%s1403_s0 + $0x48] sm:$0xff] }
   0x9   :  { %934 = vmatpush.msra.mxu2 %v52_v3  ;;  %935 = vmatpush.msra.mxu3 %v52_v3  ;;  %v32_v18 = vld [vmem:[%s1403_s0 + $0x40] sm:$0xff]  ;;  %v31_v24 = vld [vmem:[%s1403_s0 + $0x38] sm:$0xff]  ;;  %v1091_v27 = vld [vmem:[%s1404_s2 + $0x8] sm:$0xff] }
   0xa   :  { %60 = vmatpush.msra.mxu0 %v51_v4  ;;  %936 = vmatpush.msra.mxu1 %v51_v4  ;;  %v1086_v26 = vld [vmem:[%s1404_s2 + $0x18] sm:$0xff]  ;;  %v1097_v29 = vld [vmem:[%s1404_s2 + $0x20] sm:$0xff]  ;;  %v1102_v30 = vld [vmem:[%s1404_s2 + $0x28] sm:$0xff]  ;;  %v177_v31 = vmul.f32 0.0, %v1091_v27 }
   0xb   :  { %937 = vmatpush.msra.mxu2 %v51_v4  ;;  %938 = vmatpush.msra.mxu3 %v51_v4  ;;  %v179_v28 = vmul.f32 0.0, %v1086_v26  ;;  %v1108_v32 = vld [vmem:[%s1404_s2 + $0x10] sm:$0xff]  ;;  %v181_v35 = vmul.f32 0.0, %v1102_v30  ;;  %v1124_v38 = vld [vmem:[%s1404_s2 + $0x38] sm:$0xff]  ;;  %v1129_v39 = vld [vmem:[%s1404_s2 + $0x48] sm:$0xff] }
   0xc   :  { %61 = vmatpush.msra.mxu0 %v50_v5  ;;  %939 = vmatpush.msra.mxu1 %v50_v5  ;;  %v34_v33 = vld [vmem:[%s1403_s0 + $0x50] sm:$0xff]  ;;  %v178_v37 = vadd.f32 %v1108_v32, %v177_v31  ;;  %v183_v42 = vmul.f32 0.0, %v1124_v38  ;;  %v185_v43 = vmul.f32 0.0, %v1129_v39  ;;  %v1137_v45 = vld [vmem:[%s1404_s2 + $0x40] sm:$0xff]  ;;  %v35_v1 = vld [vmem:[%s1403_s0 + $0x58] sm:$0xff] }
   0xd   :  { %940 = vmatpush.msra.mxu2 %v50_v5  ;;  %941 = vmatpush.msra.mxu3 %v50_v5  ;;  %v180_v34 = vadd.f32 %v1097_v29, %v179_v28  ;;  %v1118_v36 = vld [vmem:[%s1404_s2 + $0x30] sm:$0xff]  ;;  %v1147_v50 = vld [vmem:[%s1404_s2] sm:$0xff] }
   0xe   :  { %62 = vmatpush.msra.mxu0 %v49_v6  ;;  %942 = vmatpush.msra.mxu1 %v49_v6  ;;  %v182_v40 = vadd.f32 %v1118_v36, %v181_v35  ;;  %v196_v44 = vmul.f32 %v178_v37, %v178_v37  ;;  %v1142_v46 = vld [vmem:[%s1404_s2 + $0x50] sm:$0xff]  ;;  %v184_v51 = vadd.f32 %v1137_v45, %v183_v42 }
   0xf   :  { %943 = vmatpush.msra.mxu2 %v49_v6  ;;  %944 = vmatpush.msra.mxu3 %v49_v6  ;;  %v193_v41 = vmul.f32 %v180_v34, %v180_v34  ;;  %v186_v52 = vadd.f32 %v1142_v46, %v185_v43  ;;  %v218_v55 = vmul.f32 %v1086_v26, %v180_v34  ;;  %v984_v6 = vmov 0.0  }
  0x10   :  { %63 = vmatpush.msra.mxu0 %v48_v7  ;;  %945 = vmatpush.msra.mxu1 %v48_v7  ;;  %v192_v47 = vmul.f32 120.0, %v182_v40  ;;  %v197_v53 = vmul.f32 %v196_v44, %v196_v44  ;;  %v200_v60 = vmul.f32 %v184_v51, %v184_v51  ;;  %v216_v0 = vmul.f32 %v1091_v27, %v178_v37 }
  0x11   :  { %946 = vmatpush.msra.mxu2 %v48_v7  ;;  %947 = vmatpush.msra.mxu3 %v48_v7  ;;  %v194_v48 = vmul.f32 %v193_v41, %v180_v34  ;;  %v199_v59 = vmul.f32 0.1, %v186_v52  ;;  %v219_v2 = vadd.f32 %v1097_v29, %v218_v55  ;;  %v220_v5 = vmul.f32 %v1102_v30, %v182_v40 }
  0x12   :  { %64 = vmatpush.msra.mxu0 %v47_v8  ;;  %948 = vmatpush.msra.mxu1 %v47_v8  ;;  %v198_v58 = vmul.f32 36.0, %v197_v53 }
  0x13   :  { %949 = vmatpush.msra.mxu2 %v47_v8  ;;  %950 = vmatpush.msra.mxu3 %v47_v8  ;;  %v195_v57 = vmul.f32 %v194_v48, %v192_v47  ;;  %v258_v35 = vmul.f32 %v1086_v26, %v219_v2 }
  0x14   :  { %65 = vmatpush.msra.mxu0 %v46_v9  ;;  %951 = vmatpush.msra.mxu1 %v46_v9 }
  0x15   :  { %952 = vmatpush.msra.mxu2 %v46_v9  ;;  %953 = vmatpush.msra.mxu3 %v46_v9  ;;  %v201_v9 = vmul.f32 %v200_v60, %v199_v59  ;;  %v259_v53 = vadd.f32 %v1097_v29, %v258_v35 }
  0x16   :  { %66 = vmatpush.msra.mxu0 %v45_v10  ;;  %954 = vmatpush.msra.mxu1 %v45_v10 }
  0x17   :  { %955 = vmatpush.msra.mxu2 %v45_v10  ;;  %956 = vmatpush.msra.mxu3 %v45_v10 }
  0x18   :  { %67 = vmatpush.msra.mxu0 %v44_v11  ;;  %957 = vmatpush.msra.mxu1 %v44_v11 }
  0x19   :  { %958 = vmatpush.msra.mxu2 %v44_v11  ;;  %959 = vmatpush.msra.mxu3 %v44_v11 }
  0x1a   :  { %68 = vmatpush.msra.mxu0 %v43_v12  ;;  %960 = vmatpush.msra.mxu1 %v43_v12 }
  0x1b   :  { %961 = vmatpush.msra.mxu2 %v43_v12  ;;  %962 = vmatpush.msra.mxu3 %v43_v12 }
  0x1c   :  { %69 = vmatpush.msra.mxu0 %v42_v13  ;;  %963 = vmatpush.msra.mxu1 %v42_v13 }
  0x1d   :  { %964 = vmatpush.msra.mxu2 %v42_v13  ;;  %965 = vmatpush.msra.mxu3 %v42_v13  ;;  %v217_v13 = vadd.f32 %v1108_v32, %v216_v0 }
  0x1e   :  { %70 = vmatpush.msra.mxu0 %v41_v14  ;;  %966 = vmatpush.msra.mxu1 %v41_v14 }
  0x1f   :  { %967 = vmatpush.msra.mxu2 %v41_v14  ;;  %968 = vmatpush.msra.mxu3 %v41_v14  ;;  %v256_v43 = vmul.f32 %v1091_v27, %v217_v13 }
  0x20   :  { %71 = vmatpush.msra.mxu0 %v40_v15  ;;  %969 = vmatpush.msra.mxu1 %v40_v15 }
  0x21   :  { %72 = vmatmul.f32.vlgmr.msra.gmra.mxu0 %v24_v16  ;;  %84 = vmatmul.f32.vlgmr.msra.gmra.mxu1 %v28_v17  ;;  %v221_v16 = vadd.f32 %v1118_v36, %v220_v5  ;;  %v233_v17 = vmul.f32 %v219_v2, %v219_v2 }
  0x22   :  { %970 = vmatpush.msra.mxu2 %v40_v15  ;;  %971 = vmatpush.msra.mxu3 %v40_v15 }
  0x23   :  { %96 = vmatmul.f32.vlgmr.msra.gmra.mxu2 %v32_v18  ;;  %v222_v18 = vmul.f32 %v1124_v38, %v184_v51  ;;  %v36_v51 = vld [vmem:[%s1403_s0 + $0x60] sm:$0xff] }
  0x24   :  { %108 = vmatmul.f32.vlgmr.msra.gmra.mxu3 %v36_v51 }
  0x25   :  { %v223_v28 = vadd.f32 %v1137_v45, %v222_v18 }
  0x27   :  { %v240_v42 = vmul.f32 %v223_v28, %v223_v28 }
  0x29   :  { %75 = vmatmul.f32.gmra.mxu0 %v25_v19  ;;  %87 = vmatmul.f32.gmra.mxu1 %v29_v20  ;;  %v224_v19 = vmul.f32 %v1129_v39, %v186_v52 }
  0x2b   :  { %99 = vmatmul.f32.gmra.mxu2 %v33_v25  ;;  %v234_v25 = vmul.f32 %v233_v17, %v219_v2  ;;  %v225_v31 = vadd.f32 %v1142_v46, %v224_v19  ;;  %v273_v2 = vmul.f32 %v259_v53, %v259_v53 }
  0x2d   :  { %v239_v41 = vmul.f32 0.1, %v225_v31 }
  0x2f   :  { %v241_v59 = vmul.f32 %v240_v42, %v239_v41 }
  0x31   :  { %78 = vmatmul.f32.gmra.mxu0 %v26_v21  ;;  %90 = vmatmul.f32.gmra.mxu1 %v30_v22  ;;  %v236_v22 = vmul.f32 %v217_v13, %v217_v13 }
  0x33   :  { %102 = vmatmul.f32.gmra.mxu2 %v34_v33  ;;  %v237_v34 = vmul.f32 %v236_v22, %v236_v22 }
  0x35   :  { %v238_v47 = vmul.f32 36.0, %v237_v34 }
  0x39   :  { %81 = vmatmul.f32.gmra.mxu0 %v27_v23  ;;  %93 = vmatmul.f32.gmra.mxu1 %v31_v24  ;;  %v232_v24 = vmul.f32 120.0, %v221_v16 }
  0x3b   :  { %105 = vmatmul.f32.gmra.mxu2 %v35_v1  ;;  %v235_v40 = vmul.f32 %v234_v25, %v232_v24 }
  0x9e   :  { %v73_v49 = vpop.f32.mrf.mxu0 }
  0x9f   :  { %v923_v54 = vadd.f32 3.1800003, %v73_v49 }
  0xa1   :  { %v175_v56 = vmul.f32 %v923_v54, %v1147_v50 }
  0xa3   :  { %v816_v61 = vadd.f32 -2.0, %v175_v56  ;;  %v818_v62 = vadd.f32 -115.0, %v175_v56  ;;  %v819_v63 = vadd.f32 12.0, %v175_v56  ;;  %v820_v4 = vadd.f32 -10.6, %v175_v56 }
  0xa4   :  { %v821_v11 = vadd.f32 -120.0, %v175_v56 }
  0xa5   :  { %vm188_vm0 = vcmp.gt.f32.partialorder %v816_v61, 0.0  ;;  %v203_v3 = vmul.f32 %v818_v62, %v195_v57  ;;  %v205_v10 = vmul.f32 %v819_v63, %v198_v58  ;;  %v207_v14 = vmul.f32 0.3, %v820_v4 }
  0xa6   :  { %v817_v7 = vsel %vm188_vm0, 1.0, %v984_v6  ;;  %v76_v8 = vpop.f32.mrf.mxu0  ;;  %v209_v20 = vmul.f32 %v821_v11, %v201_v9  ;;  %v257_v58 = vadd.f32 %v1108_v32, %v256_v43  ;;  %v274_v11 = vmul.f32 %v273_v2, %v259_v53 }
  0xa7   :  { %191 = vst [vmem:[%s1405_s3] sm:$0xff] %v817_v7  ;;  %v210_v12 = vsub.f32 %v76_v8, %v203_v3  ;;  %v262_v3 = vmul.f32 %v1124_v38, %v223_v28  ;;  %v264_v8 = vmul.f32 %v1129_v39, %v225_v31  ;;  %v37_v28 = vld [vmem:[%s1403_s0 + $0x68] sm:$0xff] }
  0xa8   :  { %v276_v4 = vmul.f32 %v257_v58, %v257_v58  ;;  %111 = vmatmul.f32.gmra.mxu3 %v37_v28 }
  0xa9   :  { %v211_v15 = vsub.f32 %v210_v12, %v205_v10  ;;  %v263_v12 = vadd.f32 %v1137_v45, %v262_v3 }
  0xaa   :  { %v277_v13 = vmul.f32 %v276_v4, %v276_v4 }
  0xab   :  { %v212_v21 = vsub.f32 %v211_v15, %v207_v14  ;;  %v265_v15 = vadd.f32 %v1142_v46, %v264_v8 }
  0xac   :  { %v278_v19 = vmul.f32 36.0, %v277_v13  ;;  %v85_v13 = vpop.f32.mrf.mxu1 }
  0xad   :  { %v213_v23 = vsub.f32 %v212_v21, %v209_v20  ;;  %v280_v20 = vmul.f32 %v263_v12, %v263_v12  ;;  %v296_v21 = vmul.f32 %v1091_v27, %v257_v58 }
  0xae   :  { %v79_v52 = vpop.f32.mrf.mxu0 }
  0xaf   :  { %v214_v33 = vmul.f32 %v213_v23, %v1147_v50  ;;  %v279_v23 = vmul.f32 0.1, %v265_v15  ;;  %v297_v41 = vadd.f32 %v1108_v32, %v296_v21 }
  0xb1   :  { %v215_v37 = vadd.f32 %v214_v33, %v175_v56  ;;  %v260_v56 = vmul.f32 %v1102_v30, %v221_v16  ;;  %v298_v16 = vmul.f32 %v1086_v26, %v259_v53  ;;  %v281_v42 = vmul.f32 %v280_v20, %v279_v23 }
  0xb2   :  { %v302_v53 = vmul.f32 %v1124_v38, %v263_v12  ;;  %v38_v12 = vld [vmem:[%s1403_s0 + $0x70] sm:$0xff] }
  0xb3   :  { %v822_v44 = vadd.f32 -2.0, %v215_v37  ;;  %v825_v48 = vadd.f32 -115.0, %v215_v37  ;;  %v826_v49 = vadd.f32 12.0, %v215_v37  ;;  %v827_v55 = vadd.f32 -10.6, %v215_v37  ;;  %114 = vmatmul.f32.gmra.mxu3 %v38_v12 }
  0xb4   :  { %v828_v61 = vadd.f32 -120.0, %v215_v37  ;;  %v261_v1 = vadd.f32 %v1118_v36, %v260_v56  ;;  %v299_v33 = vadd.f32 %v1097_v29, %v298_v16 }
  0xb5   :  { %vm227_vm1 = vcmp.gt.f32.partialorder %v822_v44, 0.0  ;;  %v243_v54 = vmul.f32 %v825_v48, %v235_v40  ;;  %v245_v60 = vmul.f32 %v826_v49, %v238_v47  ;;  %v247_v63 = vmul.f32 0.3, %v827_v55 }
  0xb6   :  { %v823_v57 = vsel %vm227_vm1, 1.0, %v984_v6  ;;  %v249_v5 = vmul.f32 %v828_v61, %v241_v59  ;;  %v272_v10 = vmul.f32 120.0, %v261_v1  ;;  %v82_v31 = vpop.f32.mrf.mxu0  ;;  %v303_v61 = vadd.f32 %v1137_v45, %v302_v53 }
  0xb7   :  { %824 = vst [vmem:[%s1405_s3 + $0x8] sm:$0xff] %v823_v57  ;;  %v250_v62 = vsub.f32 %v79_v52, %v243_v54  ;;  %v313_v52 = vmul.f32 %v299_v33, %v299_v33  ;;  %v316_v54 = vmul.f32 %v297_v41, %v297_v41  ;;  %v304_v57 = vmul.f32 %v1129_v39, %v265_v15 }
  0xb8   :  { %v275_v18 = vmul.f32 %v274_v11, %v272_v10 }
  0xb9   :  { %v251_v0 = vsub.f32 %v250_v62, %v245_v60  ;;  %v314_v60 = vmul.f32 %v313_v52, %v299_v33  ;;  %v317_v62 = vmul.f32 %v316_v54, %v316_v54 }
  0xbb   :  { %v252_v7 = vsub.f32 %v251_v0, %v247_v63  ;;  %v305_v0 = vadd.f32 %v1142_v46, %v304_v57  ;;  %v318_v4 = vmul.f32 36.0, %v317_v62  ;;  %v88_v62 = vpop.f32.mrf.mxu1 }
  0xbd   :  { %v253_v9 = vsub.f32 %v252_v7, %v249_v5  ;;  %v320_v5 = vmul.f32 %v303_v61, %v303_v61  ;;  %v336_v7 = vmul.f32 %v1091_v27, %v297_v41 }
  0xbf   :  { %v254_v14 = vmul.f32 %v253_v9, %v1147_v50  ;;  %v319_v9 = vmul.f32 0.1, %v305_v0 }
  0xc1   :  { %v255_v17 = vadd.f32 %v254_v14, %v215_v37  ;;  %v300_v37 = vmul.f32 %v1102_v30, %v261_v1  ;;  %v338_v1 = vmul.f32 %v1086_v26, %v299_v33  ;;  %v321_v20 = vmul.f32 %v320_v5, %v319_v9 }
  0xc2   :  { %v342_v33 = vmul.f32 %v1124_v38, %v303_v61  ;;  %v39_v61 = vld [vmem:[%s1403_s0 + $0x78] sm:$0xff] }
  0xc3   :  { %v829_v22 = vadd.f32 -2.0, %v255_v17  ;;  %v832_v24 = vadd.f32 -115.0, %v255_v17  ;;  %v833_v25 = vadd.f32 12.0, %v255_v17  ;;  %v834_v35 = vadd.f32 -10.6, %v255_v17  ;;  %117 = vmatmul.f32.gmra.mxu3 %v39_v61 }
  0xc4   :  { %v835_v44 = vadd.f32 -120.0, %v255_v17  ;;  %v301_v51 = vadd.f32 %v1118_v36, %v300_v37  ;;  %v339_v14 = vadd.f32 %v1097_v29, %v338_v1 }
  0xc5   :  { %vm267_vm2 = vcmp.gt.f32.partialorder %v829_v22, 0.0  ;;  %v283_v34 = vmul.f32 %v832_v24, %v275_v18  ;;  %v285_v43 = vmul.f32 %v833_v25, %v278_v19  ;;  %v287_v48 = vmul.f32 0.3, %v834_v35 }
  0xc6   :  { %v830_v40 = vsel %vm267_vm2, 1.0, %v984_v6  ;;  %v289_v55 = vmul.f32 %v835_v44, %v281_v42  ;;  %v312_v59 = vmul.f32 120.0, %v301_v51  ;;  %v337_v19 = vadd.f32 %v1108_v32, %v336_v7 }
  0xc7   :  { %831 = vst [vmem:[%s1405_s3 + $0x10] sm:$0xff] %v830_v40  ;;  %v290_v47 = vsub.f32 %v82_v31, %v283_v34  ;;  %v353_v31 = vmul.f32 %v339_v14, %v339_v14  ;;  %v344_v40 = vmul.f32 %v1129_v39, %v305_v0  ;;  %v343_v44 = vadd.f32 %v1137_v45, %v342_v33 }
  0xc8   :  { %v315_v3 = vmul.f32 %v314_v60, %v312_v59  ;;  %v356_v34 = vmul.f32 %v337_v19, %v337_v19 }
  0xc9   :  { %v291_v49 = vsub.f32 %v290_v47, %v285_v43  ;;  %v354_v43 = vmul.f32 %v353_v31, %v339_v14 }
  0xca   :  { %v357_v47 = vmul.f32 %v356_v34, %v356_v34 }
  0xcb   :  { %v292_v56 = vsub.f32 %v291_v49, %v287_v48  ;;  %v345_v49 = vadd.f32 %v1142_v46, %v344_v40 }
  0xcc   :  { %v358_v54 = vmul.f32 36.0, %v357_v47 }
  0xcd   :  { %v293_v58 = vsub.f32 %v292_v56, %v289_v55  ;;  %v360_v55 = vmul.f32 %v343_v44, %v343_v44  ;;  %v376_v56 = vmul.f32 %v1091_v27, %v337_v19 }
  0xcf   :  { %v294_v63 = vmul.f32 %v293_v58, %v1147_v50  ;;  %v359_v58 = vmul.f32 0.1, %v345_v49 }
  0xd1   :  { %v295_v2 = vadd.f32 %v294_v63, %v255_v17  ;;  %v340_v17 = vmul.f32 %v1102_v30, %v301_v51  ;;  %v378_v51 = vmul.f32 %v1086_v26, %v339_v14  ;;  %v361_v5 = vmul.f32 %v360_v55, %v359_v58 }
  0xd2   :  { %v382_v14 = vmul.f32 %v1124_v38, %v343_v44  ;;  %v91_v44 = vpop.f32.mrf.mxu1 }
  0xd3   :  { %v836_v8 = vadd.f32 -2.0, %v295_v2  ;;  %v839_v10 = vadd.f32 -115.0, %v295_v2  ;;  %v840_v11 = vadd.f32 12.0, %v295_v2  ;;  %v841_v16 = vadd.f32 -10.6, %v295_v2 }
  0xd4   :  { %v842_v22 = vadd.f32 -120.0, %v295_v2  ;;  %v341_v28 = vadd.f32 %v1118_v36, %v340_v17  ;;  %v379_v63 = vadd.f32 %v1097_v29, %v378_v51 }
  0xd5   :  { %vm307_vm3 = vcmp.gt.f32.partialorder %v836_v8, 0.0  ;;  %v323_v15 = vmul.f32 %v839_v10, %v315_v3  ;;  %v325_v21 = vmul.f32 %v840_v11, %v318_v4  ;;  %v327_v24 = vmul.f32 0.3, %v841_v16 }
  0xd6   :  { %v837_v18 = vsel %vm307_vm3, 1.0, %v984_v6  ;;  %v329_v35 = vmul.f32 %v842_v22, %v321_v20  ;;  %v352_v42 = vmul.f32 120.0, %v341_v28  ;;  %v377_v4 = vadd.f32 %v1108_v32, %v376_v56 }
  0xd7   :  { %838 = vst [vmem:[%s1405_s3 + $0x18] sm:$0xff] %v837_v18  ;;  %v330_v23 = vsub.f32 %v85_v13, %v323_v15  ;;  %v393_v13 = vmul.f32 %v379_v63, %v379_v63  ;;  %v384_v18 = vmul.f32 %v1129_v39, %v345_v49  ;;  %v383_v22 = vadd.f32 %v1137_v45, %v382_v14 }
  0xd8   :  { %v355_v53 = vmul.f32 %v354_v43, %v352_v42  ;;  %v396_v15 = vmul.f32 %v377_v4, %v377_v4 }
  0xd9   :  { %v331_v25 = vsub.f32 %v330_v23, %v325_v21  ;;  %v394_v21 = vmul.f32 %v393_v13, %v379_v63 }
  0xda   :  { %v397_v23 = vmul.f32 %v396_v15, %v396_v15 }
  0xdb   :  { %v332_v37 = vsub.f32 %v331_v25, %v327_v24  ;;  %v385_v25 = vadd.f32 %v1142_v46, %v384_v18 }
  0xdc   :  { %v398_v34 = vmul.f32 36.0, %v397_v23 }
  0xdd   :  { %v333_v41 = vsub.f32 %v332_v37, %v329_v35  ;;  %v400_v35 = vmul.f32 %v383_v22, %v383_v22  ;;  %v416_v37 = vmul.f32 %v1091_v27, %v377_v4 }
  0xdf   :  { %v334_v48 = vmul.f32 %v333_v41, %v1147_v50  ;;  %v399_v41 = vmul.f32 0.1, %v385_v25 }
  0xe1   :  { %v335_v52 = vadd.f32 %v334_v48, %v295_v2  ;;  %v380_v2 = vmul.f32 %v1102_v30, %v341_v28  ;;  %v418_v28 = vmul.f32 %v1086_v26, %v379_v63 }
  0xe3   :  { %v843_v57 = vadd.f32 -2.0, %v335_v52  ;;  %v846_v59 = vadd.f32 -115.0, %v335_v52  ;;  %v847_v60 = vadd.f32 12.0, %v335_v52  ;;  %v848_v1 = vadd.f32 -10.6, %v335_v52 }
  0xe4   :  { %v849_v8 = vadd.f32 -120.0, %v335_v52  ;;  %v381_v12 = vadd.f32 %v1118_v36, %v380_v2  ;;  %v419_v47 = vadd.f32 %v1097_v29, %v418_v28  ;;  %v424_v2 = vmul.f32 %v1129_v39, %v385_v25 }
  0xe5   :  { %vm347_vm4 = vcmp.gt.f32.partialorder %v843_v57, 0.0  ;;  %v363_v0 = vmul.f32 %v846_v59, %v355_v53  ;;  %v365_v7 = vmul.f32 %v847_v60, %v358_v54  ;;  %v367_v10 = vmul.f32 0.3, %v848_v1 }
  0xe6   :  { %v844_v3 = vsel %vm347_vm4, 1.0, %v984_v6  ;;  %v369_v16 = vmul.f32 %v849_v8, %v361_v5  ;;  %v392_v20 = vmul.f32 120.0, %v381_v12  ;;  %v420_v51 = vmul.f32 %v1102_v30, %v381_v12 }
  0xe7   :  { %845 = vst [vmem:[%s1405_s3 + $0x20] sm:$0xff] %v844_v3  ;;  %v370_v9 = vsub.f32 %v88_v62, %v363_v0  ;;  %v401_v54 = vmul.f32 %v400_v35, %v399_v41  ;;  %v433_v61 = vmul.f32 %v419_v47, %v419_v47  ;;  %v422_v62 = vmul.f32 %v1124_v38, %v383_v22 }
  0xe8   :  { %v395_v33 = vmul.f32 %v394_v21, %v392_v20  ;;  %v421_v60 = vadd.f32 %v1118_v36, %v420_v51  ;;  %v94_v21 = vpop.f32.mrf.mxu1 }
  0xe9   :  { %v371_v11 = vsub.f32 %v370_v9, %v365_v7  ;;  %v434_v5 = vmul.f32 %v433_v61, %v419_v47  ;;  %v423_v7 = vadd.f32 %v1137_v45, %v422_v62 }
  0xea   :  { %v432_v4 = vmul.f32 120.0, %v421_v60  ;;  %v460_v25 = vmul.f32 %v1102_v30, %v421_v60 }
  0xeb   :  { %v372_v17 = vsub.f32 %v371_v11, %v367_v10  ;;  %v425_v10 = vadd.f32 %v1142_v46, %v424_v2  ;;  %v458_v11 = vmul.f32 %v1086_v26, %v419_v47  ;;  %v440_v15 = vmul.f32 %v423_v7, %v423_v7 }
  0xec   :  { %v435_v13 = vmul.f32 %v434_v5, %v432_v4  ;;  %v97_v5 = vpop.f32.mrf.mxu2 }
  0xed   :  { %v373_v19 = vsub.f32 %v372_v17, %v369_v16  ;;  %v439_v18 = vmul.f32 0.1, %v425_v10  ;;  %v459_v22 = vadd.f32 %v1097_v29, %v458_v11  ;;  %v464_v51 = vmul.f32 %v1129_v39, %v425_v10 }
  0xef   :  { %v374_v24 = vmul.f32 %v373_v19, %v1147_v50 }
  0xf1   :  { %v375_v31 = vadd.f32 %v374_v24, %v335_v52  ;;  %v417_v52 = vadd.f32 %v1108_v32, %v416_v37 }
  0xf3   :  { %v850_v40 = vadd.f32 -2.0, %v375_v31  ;;  %v853_v42 = vadd.f32 -115.0, %v375_v31  ;;  %v854_v43 = vadd.f32 12.0, %v375_v31  ;;  %v855_v49 = vadd.f32 -10.6, %v375_v31 }
  0xf4   :  { %v856_v56 = vadd.f32 -120.0, %v375_v31  ;;  %v436_v63 = vmul.f32 %v417_v52, %v417_v52  ;;  %v456_v16 = vmul.f32 %v1091_v27, %v417_v52 }
  0xf5   :  { %vm387_vm5 = vcmp.gt.f32.partialorder %v850_v40, 0.0  ;;  %v403_v48 = vmul.f32 %v853_v42, %v395_v33  ;;  %v405_v55 = vmul.f32 %v854_v43, %v398_v34  ;;  %v407_v58 = vmul.f32 0.3, %v855_v49 }
  0xf6   :  { %v851_v53 = vsel %vm387_vm5, 1.0, %v984_v6  ;;  %v409_v0 = vmul.f32 %v856_v56, %v401_v54  ;;  %v437_v8 = vmul.f32 %v436_v63, %v436_v63  ;;  %v441_v33 = vmul.f32 %v440_v15, %v439_v18 }
  0xf7   :  { %852 = vst [vmem:[%s1405_s3 + $0x28] sm:$0xff] %v851_v53  ;;  %v410_v57 = vsub.f32 %v91_v44, %v403_v48  ;;  %v461_v42 = vadd.f32 %v1118_v36, %v460_v25  ;;  %v473_v43 = vmul.f32 %v459_v22, %v459_v22  ;;  %v462_v44 = vmul.f32 %v1124_v38, %v423_v7 }
  0xf8   :  { %v438_v14 = vmul.f32 36.0, %v437_v8 }
  0xf9   :  { %v411_v59 = vsub.f32 %v410_v57, %v405_v55  ;;  %v472_v52 = vmul.f32 120.0, %v461_v42  ;;  %v474_v54 = vmul.f32 %v473_v43, %v459_v22  ;;  %v463_v55 = vadd.f32 %v1137_v45, %v462_v44 }
  0xfa   :  { %v500_v10 = vmul.f32 %v1102_v30, %v461_v42 }
  0xfb   :  { %v412_v1 = vsub.f32 %v411_v59, %v407_v58  ;;  %v465_v58 = vadd.f32 %v1142_v46, %v464_v51  ;;  %v498_v59 = vmul.f32 %v1086_v26, %v459_v22  ;;  %v475_v61 = vmul.f32 %v474_v54, %v472_v52  ;;  %v100_v54 = vpop.f32.mrf.mxu2 }
  0xfc   :  { %v480_v63 = vmul.f32 %v463_v55, %v463_v55 }
  0xfd   :  { %v413_v3 = vsub.f32 %v412_v1, %v409_v0  ;;  %v479_v2 = vmul.f32 0.1, %v465_v58  ;;  %v499_v7 = vadd.f32 %v1097_v29, %v498_v59  ;;  %v504_v25 = vmul.f32 %v1129_v39, %v465_v58 }
  0xff   :  { %v414_v9 = vmul.f32 %v413_v3, %v1147_v50 }
 0x101   :  { %v415_v12 = vadd.f32 %v414_v9, %v375_v31  ;;  %v457_v31 = vadd.f32 %v1108_v32, %v456_v16 }
 0x103   :  { %v857_v17 = vadd.f32 -2.0, %v415_v12  ;;  %v860_v19 = vadd.f32 -115.0, %v415_v12  ;;  %v861_v20 = vadd.f32 12.0, %v415_v12  ;;  %v862_v24 = vadd.f32 -10.6, %v415_v12 }
 0x104   :  { %v863_v35 = vadd.f32 -120.0, %v415_v12  ;;  %v476_v47 = vmul.f32 %v457_v31, %v457_v31  ;;  %v496_v0 = vmul.f32 %v1091_v27, %v457_v31 }
 0x105   :  { %vm427_vm6 = vcmp.gt.f32.partialorder %v857_v17, 0.0  ;;  %v443_v23 = vmul.f32 %v860_v19, %v435_v13  ;;  %v445_v34 = vmul.f32 %v861_v20, %v438_v14  ;;  %v447_v40 = vmul.f32 0.3, %v862_v24 }
 0x106   :  { %v858_v28 = vsel %vm427_vm6, 1.0, %v984_v6  ;;  %v449_v48 = vmul.f32 %v863_v35, %v441_v33  ;;  %v477_v56 = vmul.f32 %v476_v47, %v476_v47  ;;  %v481_v13 = vmul.f32 %v480_v63, %v479_v2 }
 0x107   :  { %859 = vst [vmem:[%s1405_s3 + $0x30] sm:$0xff] %v858_v28  ;;  %v450_v37 = vsub.f32 %v94_v21, %v443_v23  ;;  %v501_v19 = vadd.f32 %v1118_v36, %v500_v10  ;;  %v513_v20 = vmul.f32 %v499_v7, %v499_v7  ;;  %v502_v21 = vmul.f32 %v1124_v38, %v463_v55 }
 0x108   :  { %v478_v62 = vmul.f32 36.0, %v477_v56 }
 0x109   :  { %v451_v41 = vsub.f32 %v450_v37, %v445_v34  ;;  %v512_v31 = vmul.f32 120.0, %v501_v19  ;;  %v514_v33 = vmul.f32 %v513_v20, %v499_v7  ;;  %v503_v34 = vadd.f32 %v1137_v45, %v502_v21 }
 0x10a   :  { %v540_v58 = vmul.f32 %v1102_v30, %v501_v19 }
 0x10b   :  { %v452_v49 = vsub.f32 %v451_v41, %v447_v40  ;;  %v505_v40 = vadd.f32 %v1142_v46, %v504_v25  ;;  %v538_v41 = vmul.f32 %v1086_v26, %v499_v7  ;;  %v515_v43 = vmul.f32 %v514_v33, %v512_v31  ;;  %v103_v33 = vpop.f32.mrf.mxu2 }
 0x10c   :  { %v520_v47 = vmul.f32 %v503_v34, %v503_v34 }
 0x10d   :  { %v453_v53 = vsub.f32 %v452_v49, %v449_v48  ;;  %v519_v51 = vmul.f32 0.1, %v505_v40  ;;  %v539_v55 = vadd.f32 %v1097_v29, %v538_v41  ;;  %v544_v10 = vmul.f32 %v1129_v39, %v505_v40 }
 0x10f   :  { %v454_v57 = vmul.f32 %v453_v53, %v1147_v50 }
 0x111   :  { %v455_v60 = vadd.f32 %v454_v57, %v415_v12  ;;  %v497_v12 = vadd.f32 %v1108_v32, %v496_v0 }
 0x113   :  { %v864_v1 = vadd.f32 -2.0, %v455_v60  ;;  %v867_v3 = vadd.f32 -115.0, %v455_v60  ;;  %v868_v4 = vadd.f32 12.0, %v455_v60  ;;  %v869_v9 = vadd.f32 -10.6, %v455_v60 }
 0x114   :  { %v870_v15 = vadd.f32 -120.0, %v455_v60  ;;  %v516_v22 = vmul.f32 %v497_v12, %v497_v12  ;;  %v536_v48 = vmul.f32 %v1091_v27, %v497_v12 }
 0x115   :  { %vm467_vm7 = vcmp.gt.f32.partialorder %v864_v1, 0.0  ;;  %v483_v8 = vmul.f32 %v867_v3, %v475_v61  ;;  %v485_v14 = vmul.f32 %v868_v4, %v478_v62  ;;  %v487_v17 = vmul.f32 0.3, %v869_v9 }
 0x116   :  { %v865_v11 = vsel %vm467_vm7, 1.0, %v984_v6  ;;  %v489_v23 = vmul.f32 %v870_v15, %v481_v13  ;;  %v517_v35 = vmul.f32 %v516_v22, %v516_v22  ;;  %v521_v61 = vmul.f32 %v520_v47, %v519_v51 }
 0x117   :  { %866 = vst [vmem:[%s1405_s3 + $0x38] sm:$0xff] %v865_v11  ;;  %v490_v16 = vsub.f32 %v97_v5, %v483_v8  ;;  %v541_v3 = vadd.f32 %v1118_v36, %v540_v58  ;;  %v553_v4 = vmul.f32 %v539_v55, %v539_v55  ;;  %v542_v5 = vmul.f32 %v1124_v38, %v503_v34 }
 0x118   :  { %v518_v44 = vmul.f32 36.0, %v517_v35 }
 0x119   :  { %v491_v18 = vsub.f32 %v490_v16, %v485_v14  ;;  %v552_v12 = vmul.f32 120.0, %v541_v3  ;;  %v554_v13 = vmul.f32 %v553_v4, %v539_v55  ;;  %v543_v14 = vadd.f32 %v1137_v45, %v542_v5 }
 0x11a   :  { %v580_v40 = vmul.f32 %v1102_v30, %v541_v3 }
 0x11b   :  { %v492_v24 = vsub.f32 %v491_v18, %v487_v17  ;;  %v545_v17 = vadd.f32 %v1142_v46, %v544_v10  ;;  %v578_v18 = vmul.f32 %v1086_v26, %v539_v55  ;;  %v555_v20 = vmul.f32 %v554_v13, %v552_v12  ;;  %v106_v13 = vpop.f32.mrf.mxu2 }
 0x11c   :  { %v560_v22 = vmul.f32 %v543_v14, %v543_v14 }
 0x11d   :  { %v493_v28 = vsub.f32 %v492_v24, %v489_v23  ;;  %v559_v25 = vmul.f32 0.1, %v545_v17  ;;  %v579_v34 = vadd.f32 %v1097_v29, %v578_v18  ;;  %v584_v58 = vmul.f32 %v1129_v39, %v545_v17 }
 0x11f   :  { %v494_v37 = vmul.f32 %v493_v28, %v1147_v50 }
 0x121   :  { %v495_v42 = vadd.f32 %v494_v37, %v455_v60  ;;  %v537_v60 = vadd.f32 %v1108_v32, %v536_v48 }
 0x123   :  { %v871_v49 = vadd.f32 -2.0, %v495_v42  ;;  %v874_v53 = vadd.f32 -115.0, %v495_v42  ;;  %v875_v52 = vadd.f32 12.0, %v495_v42  ;;  %v876_v57 = vadd.f32 -10.6, %v495_v42 }
 0x124   :  { %v877_v63 = vadd.f32 -120.0, %v495_v42  ;;  %v556_v7 = vmul.f32 %v537_v60, %v537_v60  ;;  %v576_v23 = vmul.f32 %v1091_v27, %v537_v60 }
 0x125   :  { %vm507_vm8 = vcmp.gt.f32.partialorder %v871_v49, 0.0  ;;  %v523_v56 = vmul.f32 %v874_v53, %v515_v43  ;;  %v525_v62 = vmul.f32 %v875_v52, %v518_v44  ;;  %v527_v1 = vmul.f32 0.3, %v876_v57 }
 0x126   :  { %v872_v59 = vsel %vm507_vm8, 1.0, %v984_v6  ;;  %v529_v8 = vmul.f32 %v877_v63, %v521_v61  ;;  %v557_v15 = vmul.f32 %v556_v7, %v556_v7  ;;  %v561_v43 = vmul.f32 %v560_v22, %v559_v25 }
 0x127   :  { %873 = vst [vmem:[%s1405_s3 + $0x40] sm:$0xff] %v872_v59  ;;  %v530_v0 = vsub.f32 %v100_v54, %v523_v56  ;;  %v581_v53 = vadd.f32 %v1118_v36, %v580_v40  ;;  %v593_v52 = vmul.f32 %v579_v34, %v579_v34  ;;  %v582_v54 = vmul.f32 %v1124_v38, %v543_v14 }
 0x128   :  { %v558_v21 = vmul.f32 36.0, %v557_v15 }
 0x129   :  { %v531_v2 = vsub.f32 %v530_v0, %v525_v62  ;;  %v592_v60 = vmul.f32 120.0, %v581_v53  ;;  %v594_v61 = vmul.f32 %v593_v52, %v579_v34  ;;  %v583_v62 = vadd.f32 %v1137_v45, %v582_v54 }
 0x12a   :  { %v620_v17 = vmul.f32 %v1102_v30, %v581_v53 }
 0x12b   :  { %v532_v9 = vsub.f32 %v531_v2, %v527_v1  ;;  %v585_v1 = vadd.f32 %v1142_v46, %v584_v58  ;;  %v618_v2 = vmul.f32 %v1086_v26, %v579_v34  ;;  %v595_v4 = vmul.f32 %v594_v61, %v592_v60  ;;  %v109_v61 = vpop.f32.mrf.mxu3 }
 0x12c   :  { %v600_v7 = vmul.f32 %v583_v62, %v583_v62 }
 0x12d   :  { %v533_v11 = vsub.f32 %v532_v9, %v529_v8  ;;  %v599_v10 = vmul.f32 0.1, %v585_v1  ;;  %v619_v14 = vadd.f32 %v1097_v29, %v618_v2  ;;  %v624_v40 = vmul.f32 %v1129_v39, %v585_v1 }
 0x12f   :  { %v534_v16 = vmul.f32 %v533_v11, %v1147_v50 }
 0x131   :  { %v535_v19 = vadd.f32 %v534_v16, %v495_v42  ;;  %v577_v42 = vadd.f32 %v1108_v32, %v576_v23 }
 0x133   :  { %v878_v24 = vadd.f32 -2.0, %v535_v19  ;;  %v881_v28 = vadd.f32 -115.0, %v535_v19  ;;  %v882_v31 = vadd.f32 12.0, %v535_v19  ;;  %v883_v37 = vadd.f32 -10.6, %v535_v19 }
 0x134   :  { %v884_v47 = vadd.f32 -120.0, %v535_v19  ;;  %v596_v55 = vmul.f32 %v577_v42, %v577_v42  ;;  %v616_v8 = vmul.f32 %v1091_v27, %v577_v42 }
 0x135   :  { %vm547_vm9 = vcmp.gt.f32.partialorder %v878_v24, 0.0  ;;  %v563_v35 = vmul.f32 %v881_v28, %v555_v20  ;;  %v565_v44 = vmul.f32 %v882_v31, %v558_v21  ;;  %v567_v49 = vmul.f32 0.3, %v883_v37 }
 0x136   :  { %v879_v41 = vsel %vm547_vm9, 1.0, %v984_v6  ;;  %v569_v56 = vmul.f32 %v884_v47, %v561_v43  ;;  %v597_v63 = vmul.f32 %v596_v55, %v596_v55  ;;  %v601_v20 = vmul.f32 %v600_v7, %v599_v10 }
 0x137   :  { %880 = vst [vmem:[%s1405_s3 + $0x48] sm:$0xff] %v879_v41  ;;  %v570_v48 = vsub.f32 %v103_v33, %v563_v35  ;;  %v621_v28 = vadd.f32 %v1118_v36, %v620_v17  ;;  %v633_v31 = vmul.f32 %v619_v14, %v619_v14  ;;  %v622_v33 = vmul.f32 %v1124_v38, %v583_v62 }
 0x138   :  { %v598_v5 = vmul.f32 36.0, %v597_v63 }
 0x139   :  { %v571_v51 = vsub.f32 %v570_v48, %v565_v44  ;;  %v632_v42 = vmul.f32 120.0, %v621_v28  ;;  %v634_v43 = vmul.f32 %v633_v31, %v619_v14  ;;  %v623_v44 = vadd.f32 %v1137_v45, %v622_v33  ;;  %v112_v33 = vpop.f32.mrf.mxu3 }
 0x13a   :  { %v660_v1 = vmul.f32 %v1102_v30, %v621_v28 }
 0x13b   :  { %v572_v57 = vsub.f32 %v571_v51, %v567_v49  ;;  %v625_v49 = vadd.f32 %v1142_v46, %v624_v40  ;;  %v658_v51 = vmul.f32 %v1086_v26, %v619_v14  ;;  %v635_v52 = vmul.f32 %v634_v43, %v632_v42 }
 0x13c   :  { %v640_v55 = vmul.f32 %v623_v44, %v623_v44 }
 0x13d   :  { %v573_v59 = vsub.f32 %v572_v57, %v569_v56  ;;  %v639_v58 = vmul.f32 0.1, %v625_v49  ;;  %v659_v62 = vadd.f32 %v1097_v29, %v658_v51  ;;  %v661_v29 = vadd.f32 %v1118_v36, %v660_v1  ;;  %v980_v1 = vld [vmem:[%s1404_s2 + $0x40] sm:$0xff] }
 0x13f   :  { %v574_v0 = vmul.f32 %v573_v59, %v1147_v50  ;;  %v673_v10 = vmul.f32 %v659_v62, %v659_v62  ;;  %v698_v36 = vmul.f32 %v1086_v26, %v659_v62 }
 0x141   :  { %v575_v3 = vadd.f32 %v574_v0, %v535_v19  ;;  %v617_v19 = vadd.f32 %v1108_v32, %v616_v8 }
 0x143   :  { %v885_v9 = vadd.f32 -2.0, %v575_v3  ;;  %v888_v11 = vadd.f32 -115.0, %v575_v3  ;;  %v889_v12 = vadd.f32 12.0, %v575_v3  ;;  %v890_v16 = vadd.f32 -10.6, %v575_v3 }
 0x144   :  { %v891_v22 = vadd.f32 -120.0, %v575_v3  ;;  %v636_v34 = vmul.f32 %v617_v19, %v617_v19  ;;  %v656_v56 = vmul.f32 %v1091_v27, %v617_v19  ;;  %v641_v27 = vmul.f32 %v640_v55, %v639_v58  ;;  %v978_v55 = vld [vmem:[%s1404_s2 + $0x38] sm:$0xff] }
 0x145   :  { %vm587_vm10 = vcmp.gt.f32.partialorder %v885_v9, 0.0  ;;  %v603_v15 = vmul.f32 %v888_v11, %v595_v4  ;;  %v605_v21 = vmul.f32 %v889_v12, %v598_v5  ;;  %v607_v24 = vmul.f32 0.3, %v890_v16 }
 0x146   :  { %v886_v18 = vsel %vm587_vm10, 1.0, %v984_v6  ;;  %v609_v35 = vmul.f32 %v891_v22, %v601_v20  ;;  %v637_v47 = vmul.f32 %v636_v34, %v636_v34  ;;  %v662_v11 = vmul.f32 %v1124_v38, %v623_v44 }
 0x147   :  { %887 = vst [vmem:[%s1405_s3 + $0x50] sm:$0xff] %v886_v18  ;;  %v610_v23 = vsub.f32 %v106_v13, %v603_v15  ;;  %v672_v15 = vmul.f32 120.0, %v661_v29  ;;  %v674_v16 = vmul.f32 %v673_v10, %v659_v62 }
 0x148   :  { %v638_v54 = vmul.f32 36.0, %v637_v47  ;;  %v663_v17 = vadd.f32 %v1137_v45, %v662_v11 }
 0x149   :  { %v611_v25 = vsub.f32 %v610_v23, %v605_v21  ;;  %v675_v22 = vmul.f32 %v674_v16, %v672_v15  ;;  %v115_v16 = vpop.f32.mrf.mxu3 }
 0x14a   :  { %v680_v23 = vmul.f32 %v663_v17, %v663_v17 }
 0x14b   :  { %v612_v37 = vsub.f32 %v611_v25, %v607_v24 }
 0x14d   :  { %v613_v41 = vsub.f32 %v612_v37, %v609_v35  ;;  %v975_v35 = vld [vmem:[%s1404_s2 + $0x28] sm:$0xff] }
 0x14e   :  { %v700_v37 = vmul.f32 %v975_v35, %v661_v29 }
 0x14f   :  { %v614_v48 = vmul.f32 %v613_v41, %v1147_v50  ;;  %v976_v41 = vld [vmem:[%s1404_s2 + $0x10] sm:$0xff] }
 0x151   :  { %v615_v53 = vadd.f32 %v614_v48, %v575_v3  ;;  %v657_v3 = vadd.f32 %v1108_v32, %v656_v56  ;;  %v664_v32 = vmul.f32 %v1129_v39, %v625_v49  ;;  %v973_v39 = vld [vmem:[%s1404_s2 + $0x8] sm:$0xff]  ;;  %v702_v56 = vmul.f32 %v978_v55, %v663_v17 }
 0x153   :  { %v892_v57 = vadd.f32 -2.0, %v615_v53  ;;  %v895_v59 = vadd.f32 -115.0, %v615_v53  ;;  %v896_v60 = vadd.f32 12.0, %v615_v53  ;;  %v897_v0 = vadd.f32 -10.6, %v615_v53 }
 0x154   :  { %v898_v5 = vadd.f32 -120.0, %v615_v53  ;;  %v676_v30 = vmul.f32 %v657_v3, %v657_v3  ;;  %v665_v20 = vadd.f32 %v1142_v46, %v664_v32  ;;  %v696_v24 = vmul.f32 %v973_v39, %v657_v3  ;;  %v974_v46 = vld [vmem:[%s1404_s2 + $0x20] sm:$0xff] }
 0x155   :  { %vm627_vm11 = vcmp.gt.f32.partialorder %v892_v57, 0.0  ;;  %v643_v63 = vmul.f32 %v895_v59, %v635_v52  ;;  %v645_v4 = vmul.f32 %v896_v60, %v638_v54  ;;  %v647_v8 = vmul.f32 0.3, %v897_v0  ;;  %v979_v60 = vld [vmem:[%s1404_s2 + $0x48] sm:$0xff] }
 0x156   :  { %v893_v2 = vsel %vm627_vm11, 1.0, %v984_v6  ;;  %v649_v12 = vmul.f32 %v898_v5, %v641_v27  ;;  %v677_v18 = vmul.f32 %v676_v30, %v676_v30  ;;  %v679_v28 = vmul.f32 0.1, %v665_v20  ;;  %v1379_v27 = vld [vmem:[%s1404_s2] sm:$0xff]  ;;  %v982_v5 = vld [vmem:[%s1404_s2 + $0x50] sm:$0xff] }
 0x157   :  { %894 = vst [vmem:[%s1405_s3 + $0x58] sm:$0xff] %v893_v2  ;;  %v650_v7 = vsub.f32 %v109_v61, %v643_v63  ;;  %v697_v42 = vadd.f32 %v976_v41, %v696_v24  ;;  %v704_v61 = vmul.f32 %v979_v60, %v665_v20  ;;  %v703_v2 = vadd.f32 %v980_v1, %v702_v56 }
 0x158   :  { %v678_v38 = vmul.f32 36.0, %v677_v18  ;;  %v681_v43 = vmul.f32 %v680_v23, %v679_v28 }
 0x159   :  { %v651_v9 = vsub.f32 %v650_v7, %v645_v4  ;;  %v716_v57 = vmul.f32 %v697_v42, %v697_v42  ;;  %v705_v7 = vadd.f32 %v982_v5, %v704_v61  ;;  %v720_v30 = vmul.f32 %v703_v2, %v703_v2 }
 0x15b   :  { %v652_v13 = vsub.f32 %v651_v9, %v647_v8  ;;  %v717_v3 = vmul.f32 %v716_v57, %v716_v57  ;;  %v983_v8 = vld [vmem:[%s1404_s2 + $0x18] sm:$0xff]  ;;  %v719_v32 = vmul.f32 0.1, %v705_v7 }
 0x15d   :  { %v653_v14 = vsub.f32 %v652_v13, %v649_v12  ;;  %v718_v11 = vmul.f32 36.0, %v717_v3  ;;  %v736_v12 = vmul.f32 %v973_v39, %v697_v42 }
 0x15f   :  { %v654_v19 = vmul.f32 %v653_v14, %v1147_v50  ;;  %v699_v50 = vadd.f32 %v974_v46, %v698_v36 }
 0x161   :  { %v655_v21 = vadd.f32 %v654_v19, %v615_v53  ;;  %v977_v53 = vld [vmem:[%s1404_s2 + $0x30] sm:$0xff]  ;;  %v713_v54 = vmul.f32 %v699_v50, %v699_v50  ;;  %v738_v9 = vmul.f32 %v983_v8, %v699_v50 }
 0x162   :  { %v701_v52 = vadd.f32 %v977_v53, %v700_v37 }
 0x163   :  { %v899_v25 = vadd.f32 -2.0, %v655_v21  ;;  %v902_v31 = vadd.f32 -115.0, %v655_v21  ;;  %v903_v45 = vadd.f32 12.0, %v655_v21  ;;  %v904_v34 = vadd.f32 -10.6, %v655_v21 }
 0x164   :  { %v905_v47 = vadd.f32 -120.0, %v655_v21  ;;  %v712_v63 = vmul.f32 120.0, %v701_v52  ;;  %v714_v0 = vmul.f32 %v713_v54, %v699_v50  ;;  %v739_v17 = vadd.f32 %v974_v46, %v738_v9 }
 0x165   :  { %vm667_vm12 = vcmp.gt.f32.partialorder %v899_v25, 0.0  ;;  %v683_v26 = vmul.f32 %v902_v31, %v675_v22  ;;  %v685_v44 = vmul.f32 %v903_v45, %v678_v38  ;;  %v687_v49 = vmul.f32 0.3, %v904_v34 }
 0x166   :  { %v900_v40 = vsel %vm667_vm12, 1.0, %v984_v6  ;;  %v689_v58 = vmul.f32 %v905_v47, %v681_v43  ;;  %v715_v10 = vmul.f32 %v714_v0, %v712_v63  ;;  %v740_v20 = vmul.f32 %v975_v35, %v701_v52 }
 0x167   :  { %901 = vst [vmem:[%s1405_s3 + $0x60] sm:$0xff] %v900_v40  ;;  %v690_v48 = vsub.f32 %v112_v33, %v683_v26  ;;  %v737_v22 = vadd.f32 %v976_v41, %v736_v12  ;;  %v753_v31 = vmul.f32 %v739_v17, %v739_v17  ;;  %v742_v45 = vmul.f32 %v978_v55, %v703_v2  ;;  %v118_v55 = vpop.f32.mrf.mxu3 }
 0x168   :  { %v741_v28 = vadd.f32 %v977_v53, %v740_v20  ;;  %v744_v26 = vmul.f32 %v979_v60, %v705_v7 }
 0x169   :  { %v691_v51 = vsub.f32 %v690_v48, %v685_v44  ;;  %v756_v33 = vmul.f32 %v737_v22, %v737_v22  ;;  %v754_v37 = vmul.f32 %v753_v31, %v739_v17  ;;  %v743_v40 = vadd.f32 %v980_v1, %v742_v45 }
 0x16a   :  { %v752_v35 = vmul.f32 120.0, %v741_v28  ;;  %v745_v43 = vadd.f32 %v982_v5, %v744_v26 }
 0x16b   :  { %v692_v59 = vsub.f32 %v691_v51, %v687_v49  ;;  %v757_v41 = vmul.f32 %v756_v33, %v756_v33  ;;  %v760_v49 = vmul.f32 %v743_v40, %v743_v40 }
 0x16c   :  { %v755_v47 = vmul.f32 %v754_v37, %v752_v35  ;;  %v759_v53 = vmul.f32 0.1, %v745_v43 }
 0x16d   :  { %v693_v62 = vsub.f32 %v692_v59, %v689_v58  ;;  %v758_v48 = vmul.f32 36.0, %v757_v41 }
 0x16e   :  { %v761_v59 = vmul.f32 %v760_v49, %v759_v53 }
 0x16f   :  { %v694_v4 = vmul.f32 %v1379_v27, %v693_v62 }
 0x171   :  { %v695_v29 = vadd.f32 %v694_v4, %v655_v21  ;;  %v721_v21 = vmul.f32 %v720_v30, %v719_v32 }
 0x173   :  { %v906_v13 = vadd.f32 -2.0, %v695_v29  ;;  %v909_v14 = vadd.f32 -115.0, %v695_v29  ;;  %v910_v15 = vadd.f32 12.0, %v695_v29  ;;  %v911_v19 = vadd.f32 -10.6, %v695_v29 }
 0x174   :  { %v912_v23 = vadd.f32 -120.0, %v695_v29 }
 0x175   :  { %vm707_vm13 = vcmp.gt.f32.partialorder %v906_v13, 0.0  ;;  %v723_v18 = vmul.f32 %v909_v14, %v715_v10  ;;  %v725_v38 = vmul.f32 %v910_v15, %v718_v11  ;;  %v727_v24 = vmul.f32 0.3, %v911_v19 }
 0x176   :  { %v907_v36 = vsel %vm707_vm13, 1.0, %v984_v6  ;;  %v729_v46 = vmul.f32 %v912_v23, %v721_v21 }
 0x177   :  { %908 = vst [vmem:[%s1405_s3 + $0x68] sm:$0xff] %v907_v36  ;;  %v730_v39 = vsub.f32 %v115_v16, %v723_v18 }
 0x179   :  { %v731_v25 = vsub.f32 %v730_v39, %v725_v38 }
 0x17b   :  { %v732_v50 = vsub.f32 %v731_v25, %v727_v24 }
 0x17d   :  { %v733_v34 = vsub.f32 %v732_v50, %v729_v46 }
 0x17f   :  { %v734_v42 = vmul.f32 %v1379_v27, %v733_v34 }
 0x181   :  { %v735_v44 = vadd.f32 %v734_v42, %v695_v29 }
 0x183   :  { %v913_v51 = vadd.f32 -2.0, %v735_v44  ;;  %v916_v52 = vadd.f32 -115.0, %v735_v44  ;;  %v917_v54 = vadd.f32 12.0, %v735_v44  ;;  %v918_v57 = vadd.f32 -10.6, %v735_v44 }
 0x184   :  { %v919_v61 = vadd.f32 -120.0, %v735_v44 }
 0x185   :  { %vm747_vm14 = vcmp.gt.f32.partialorder %v913_v51, 0.0  ;;  %v763_v56 = vmul.f32 %v916_v52, %v755_v47  ;;  %v765_v60 = vmul.f32 %v917_v54, %v758_v48  ;;  %v767_v63 = vmul.f32 0.3, %v918_v57 }
 0x186   :  { %v914_v58 = vsel %vm747_vm14, 1.0, %v984_v6  ;;  %v769_v1 = vmul.f32 %v919_v61, %v761_v59 }
 0x187   :  { %915 = vst [vmem:[%s1405_s3 + $0x70] sm:$0xff] %v914_v58  ;;  %v770_v62 = vsub.f32 %v118_v55, %v763_v56 }
 0x189   :  { %v771_v0 = vsub.f32 %v770_v62, %v765_v60 }
 0x18b   :  { %v772_v2 = vsub.f32 %v771_v0, %v767_v63 }
 0x18d   :  { %v773_v3 = vsub.f32 %v772_v2, %v769_v1 }
 0x18f   :  { %v774_v4 = vmul.f32 %v1379_v27, %v773_v3 }
 0x191   :  { %v775_v5 = vadd.f32 %v774_v4, %v735_v44 }
 0x193   :  { %v920_v7 = vadd.f32 -2.0, %v775_v5 }
 0x195   :  { %vm787_vm15 = vcmp.gt.f32.partialorder %v920_v7, 0.0 }
 0x196   :  { %v921_v8 = vsel %vm787_vm15, 1.0, %v984_v6 }
 0x197   :  { %922 = vst [vmem:[%s1405_s3 + $0x78] sm:$0xff] %v921_v8 }

</bundles_post_ra>
